<compile_context>
chip_gen: v5e
topology: v5e:2x2
jax: 0.10.0
libtpu: 0.0.40
codegen_flags: <defaults>
</compile_context>

<pallas_src>
import functools

import numpy as np
import jax
import jax.numpy as jnp
from jax import lax
from jax.experimental import pallas as pl
from jax.experimental.pallas import tpu as pltpu


# ----------------------------- fused Pallas conv kernel ----------------------

def _fused_conv_kernel(x_ref, w_ref, b_ref, o_ref, *,
                       KH, KW, stride, TOH, OH, OW,
                       negative_slope, apply_act):
    """Fused Conv2d + bias + LeakyReLU for one (image, output-row-band) grid cell.

    x_ref: (1, s*s, Hph, Wph, Cin)  bf16  phase-split padded image (VMEM resident)
    w_ref: (KH*KW, Cin, Cout)       bf16  per-tap weight matrices (VMEM resident)
    b_ref: (1, Cout)                f32
    o_ref: (1, TOH, OW, Cout)             one band of output rows
    """
    Cout = o_ref.shape[-1]
    band = pl.program_id(1)

    @pl.loop(0, TOH)
    def _row(t):
        oh = band * TOH + t                       # absolute output row index

        def compute_row():
            acc = jnp.zeros((OW, Cout), jnp.float32)
            for kh in range(KH):                  # static tap loops (KH*KW <= 16)
                r, dh = kh % stride, kh // stride
                for kw in range(KW):
                    c, dw = kw % stride, kw // stride
                    p = r * stride + c            # static phase index
                    # contiguous (OW, Cin) tap; one bf16 MXU matmul, f32 accumulate
                    tap = x_ref[0, p, oh + dh, pl.ds(dw, OW), :]
                    acc += jnp.dot(tap, w_ref[kh * KW + kw],
                                   preferred_element_type=jnp.float32)
            acc = acc + b_ref[...]                # (OW,Cout) + (1,Cout), f32
            if apply_act:
                acc = jnp.where(acc >= 0.0, acc, acc * negative_slope)
            o_ref[0, t] = acc.astype(o_ref.dtype)

        if OH % TOH == 0:                         # static: no ragged band possible
            compute_row()
        else:                                     # general shapes: mask ragged rows
            pl.when(oh < OH)(compute_row)


# ----------------------------- wrapper / glue --------------------------------

def _phase_split(x_nhwc, KH, KW, stride, pad):
    """Partition the zero-padded NHWC input into stride*stride phase sub-grids.

    Returns phases of shape (N, s*s, Hph, Wph, C) such that
      phases[n, (kh % s)*s + (kw % s), oh + kh//s, ow + kw//s, :]
        == padded_x[n, oh*s + kh, ow*s + kw, :]
    This is a pure partition (same total bytes as the padded input) — unlike im2col
    there is no KH*KW-fold duplication in HBM.
    """
    N, H, W, C = x_nhwc.shape
    OH = (H + 2 * pad - KH) // stride + 1
    OW = (W + 2 * pad - KW) // stride + 1
    Hph = OH + (KH - 1) // stride
    Wph = OW + (KW - 1) // stride
    xp = jnp.pad(x_nhwc, ((0, 0), (pad, pad), (pad, pad), (0, 0)))
    phases = []
    for r in range(stride):
        for c in range(stride):
            ph = xp[:, r::stride, c::stride, :][:, :Hph, :Wph, :]
            ph = jnp.pad(ph, ((0, 0), (0, Hph - ph.shape[1]),
                              (0, Wph - ph.shape[2]), (0, 0)))
            phases.append(ph)
    return jnp.stack(phases, axis=1), OH, OW, Hph, Wph


def conv2d_pallas(x_nhwc, w_oihw, bias, stride, pad, *,
                  negative_slope=0.2, apply_act=True,
                  out_dtype=jnp.bfloat16, rows_per_band=8):
    """Fused Conv2d (+bias) (+LeakyReLU) Pallas kernel; NHWC in -> NHWC out."""
    N, H, W, Cin = x_nhwc.shape
    Cout, Cin_w, KH, KW = w_oihw.shape
    assert Cin_w == Cin

    xph, OH, OW, Hph, Wph = _phase_split(x_nhwc.astype(jnp.bfloat16),
                                         KH, KW, stride, pad)
    P = stride * stride
    # OIHW -> (KH*KW, Cin, Cout): tap index t = kh*KW + kw selects a (Cin, Cout) matrix.
    w_taps = jnp.transpose(w_oihw, (2, 3, 1, 0)).reshape(
        KH * KW, Cin, Cout).astype(jnp.bfloat16)
    if bias is None:
        bias = jnp.zeros((Cout,), jnp.float32)
    b2 = bias.reshape(1, Cout).astype(jnp.float32)

    TOH = max(1, min(rows_per_band, OH))
    n_bands = pl.cdiv(OH, TOH)

    kernel = functools.partial(
        _fused_conv_kernel, KH=KH, KW=KW, stride=stride, TOH=TOH, OH=OH, OW=OW,
        negative_slope=negative_slope, apply_act=apply_act)

    return pl.pallas_call(
        kernel,
        out_shape=jax.ShapeDtypeStruct((N, OH, OW, Cout), out_dtype),
        grid=(N, n_bands),
        in_specs=[
            # Whole phase-split image per batch element: block index is constant
            # across row bands -> DMA'd once per image, revisited by every band.
            pl.BlockSpec((1, P, Hph, Wph, Cin), lambda n, j: (n, 0, 0, 0, 0)),
            pl.BlockSpec((KH * KW, Cin, Cout), lambda n, j: (0, 0, 0)),
            pl.BlockSpec((1, Cout), lambda n, j: (0, 0)),
        ],
        out_specs=pl.BlockSpec((1, TOH, OW, Cout), lambda n, j: (n, j, 0, 0)),
        compiler_params=pltpu.CompilerParams(
            # Both axes independent -> lets v7x's two TensorCores split the grid;
            # harmless on single-TC v5e/v6e.
            dimension_semantics=("parallel", "parallel"),
            # Explicit scoped-VMEM budget, safe on v5e (128 MiB), v6e (128 MiB)
            # and v7x (64 MiB physical); blocks here are far below it.
            vmem_limit_bytes=32 * 1024 * 1024),
    )(xph, w_taps, b2)


def _xla_conv_nhwc(x, w_oihw, b, stride, pad, act, out_dtype=jnp.float32):
    """Plain XLA conv for the lane-starved, FLOP-negligible first / last layers."""
    y = lax.conv_general_dilated(
        x.astype(jnp.float32), w_oihw.astype(jnp.float32),
        (stride, stride), [(pad, pad), (pad, pad)],
        dimension_numbers=("NHWC", "OIHW", "NHWC"))
    if b is not None:
        y = y + b.reshape(1, 1, 1, -1).astype(jnp.float32)
    if act:
        y = jnp.where(y >= 0.0, y, 0.2 * y)
    return y.astype(out_dtype)


# --------------------------- parameters (synthetic) --------------------------

def spectral_normalize(w_oihw, key, n_power_iterations=1, eps=1e-12):
    """W / sigma(W), power iteration on W.reshape(Cout, -1) (PyTorch semantics)."""
    Cout = w_oihw.shape[0]
    wm = w_oihw.reshape(Cout, -1)
    u = jax.random.normal(key, (Cout,), jnp.float32)
    u = u / jnp.maximum(jnp.linalg.norm(u), eps)
    v = wm.T @ u
    for _ in range(n_power_iterations):
        v = wm.T @ u
        v = v / jnp.maximum(jnp.linalg.norm(v), eps)
        u = wm @ v
        u = u / jnp.maximum(jnp.linalg.norm(u), eps)
    sigma = jnp.dot(u, wm @ v)
    return w_oihw / sigma


def init_params(key, num_in_ch=2, num_feat=16):
    ks = jax.random.split(key, 8)

    def uinit(k, shape):
        fan_in = shape[1] * shape[2] * shape[3]
        bound = 1.0 / np.sqrt(fan_in)
        return jax.random.uniform(k, shape, jnp.float32, -bound, bound)

    w0 = spectral_normalize(uinit(ks[0], (num_feat, num_in_ch, 3, 3)), ks[4])
    b0 = jax.random.uniform(ks[5], (num_feat,), jnp.float32, -0.1, 0.1)
    w1 = spectral_normalize(uinit(ks[1], (num_feat * 2, num_feat, 4, 4)), ks[6])
    w2 = spectral_normalize(uinit(ks[2], (num_feat * 4, num_feat * 2, 4, 4)), ks[7])
    w3 = spectral_normalize(uinit(ks[3], (num_feat * 8, num_feat * 4, 4, 4)),
                            jax.random.fold_in(key, 99))
    wo = uinit(jax.random.fold_in(key, 100), (1, num_feat * 8, 3, 3))
    bo = jax.random.uniform(jax.random.fold_in(key, 101), (1,), jnp.float32, -0.1, 0.1)
    return dict(w0=w0, b0=b0, w1=w1, w2=w2, w3=w3, wo=wo, bo=bo)


# ------------------------------- forward pass --------------------------------

def fdiscriminator_forward(params, x_nchw):
    # skip_connection flag is unused by this truncated forward (no decoder path).
    x = jnp.transpose(x_nchw, (0, 2, 3, 1))                         # NCHW -> NHWC
    # conv0: Cin=2 (lane-starved K, ~1% of FLOPs) -> XLA conv per perf review.
    x0 = _xla_conv_nhwc(x, params["w0"], params["b0"], 1, 1, act=True)
    # conv1..conv3: the FLOP hot path (>98%) -> fused Pallas conv kernels,
    # bf16 inputs/activations, f32 accumulation + bias + LeakyReLU in-kernel.
    x1 = conv2d_pallas(x0, params["w1"], None, 2, 1)
    x2 = conv2d_pallas(x1, params["w2"], None, 2, 1)
    x3 = conv2d_pallas(x2, params["w3"], None, 2, 1)
    # out: Cout=1 (lane-starved masked stores, negligible FLOPs) -> XLA conv.
    out = _xla_conv_nhwc(x3, params["wo"], params["bo"], 1, 1, act=False)
    return jnp.transpose(out, (0, 3, 1, 2))                         # NHWC -> NCHW


# -------------------------- pure-JAX reference (check) -----------------------

def _ref_conv(x, w, b, stride, pad, act):
    y = lax.conv_general_dilated(
        x, w, (stride, stride), [(pad, pad), (pad, pad)],
        dimension_numbers=("NCHW", "OIHW", "NCHW"))
    if b is not None:
        y = y + b.reshape(1, -1, 1, 1)
    if act:
        y = jnp.where(y >= 0, y, 0.2 * y)
    return y


def ref_forward(params, x_nchw):
    x0 = _ref_conv(x_nchw, params["w0"], params["b0"], 1, 1, True)
    x1 = _ref_conv(x0, params["w1"], None, 2, 1, True)
    x2 = _ref_conv(x1, params["w2"], None, 2, 1, True)
    x3 = _ref_conv(x2, params["w3"], None, 2, 1, True)
    return _ref_conv(x3, params["wo"], params["bo"], 1, 1, False)


# ------------------------------------ main ------------------------------------

if __name__ == "__main__":
    key = jax.random.PRNGKey(0)
    kx, kp = jax.random.split(key)

    N, C_IN, H, W = 2, 2, 16, 16          # small shapes; num_in_ch=2 per module default
    NUM_FEAT = 16                          # small num_feat for the synthetic test
    x = jax.random.normal(kx, (N, C_IN, H, W), jnp.float32)   # NCHW like PyTorch

    params = init_params(kp, num_in_ch=C_IN, num_feat=NUM_FEAT)

    fwd = jax.jit(fdiscriminator_forward)
    out = jax.block_until_ready(fwd(params, x))

    ref = jax.block_until_ready(ref_forward(params, x))
    assert out.shape == (N, 1, H // 8, W // 8), out.shape

    out_np = np.asarray(out, dtype=np.float32)
    ref_np = np.asarray(ref, dtype=np.float32)
    max_err = float(np.max(np.abs(out_np - ref_np)))
    # bf16 activations/weights with f32 accumulation: error stays well below 6e-2.
    assert np.allclose(out_np, ref_np, rtol=6e-2, atol=6e-2), max_err

    print("KERNEL_OK")
</pallas_src>

<mosaic_0001>
module attributes {stable_mosaic.version = 11 : i64} {
  func.func @_fused_conv_kernel(%arg0: i32, %arg1: i32, %arg2: memref<1x4x9x9x16xbf16, #tpu.memory_space<vmem>>, %arg3: memref<16x16x32xbf16, #tpu.memory_space<vmem>>, %arg4: memref<1x32xf32, #tpu.memory_space<vmem>>, %arg5: memref<1x8x8x32xbf16, #tpu.memory_space<vmem>>) attributes {dimension_semantics = [#tpu.dimension_semantics<parallel>, #tpu.dimension_semantics<parallel>], iteration_bounds = array<i64: 2, 1>, scalar_prefetch = 0 : i64, scratch_operands = 0 : i64, tpu.core_type = #tpu.core_type<tc>, window_params = [{transform_indices = @transform_0, window_bounds = array<i64: 1, 4, 9, 9, 16>}, {pipeline_mode = #tpu.pipeline_mode<synchronous>, transform_indices = @transform_1, window_bounds = array<i64: 16, 16, 32>}, {pipeline_mode = #tpu.pipeline_mode<synchronous>, transform_indices = @transform_2, window_bounds = array<i64: 1, 32>}, {transform_indices = @transform_3, window_bounds = array<i64: 1, 8, 8, 32>}]} {
    %c0_i32 = arith.constant 0 : i32
    %c8_i32 = arith.constant 8 : i32
    %0 = arith.addi %c0_i32, %c8_i32 : i32
    %c1_i32 = arith.constant 1 : i32
    scf.for %arg6 = %c0_i32 to %0 step %c1_i32  : i32 {
      %c1_i32_1 = arith.constant 1 : i32
      %1 = arith.muli %arg6, %c1_i32_1 : i32
      %c0_i32_2 = arith.constant 0 : i32
      %2 = arith.addi %c0_i32_2, %1 : i32
      %c8_i32_3 = arith.constant 8 : i32
      %3 = arith.muli %arg1, %c8_i32_3 : i32
      %4 = arith.addi %3, %2 : i32
      %cst = arith.constant 0.000000e+00 : f32
      %5 = vector.broadcast %cst : f32 to vector<8x32xf32>
      %c0_i32_4 = arith.constant 0 : i32
      %6 = arith.addi %4, %c0_i32_4 : i32
      %c0 = arith.constant 0 : index
      %c0_5 = arith.constant 0 : index
      %7 = arith.index_cast %6 : i32 to index
      %c0_6 = arith.constant 0 : index
      %c0_7 = arith.constant 0 : index
      %8 = vector.load %arg2[%c0, %c0_5, %7, %c0_6, %c0_7] : memref<1x4x9x9x16xbf16, #tpu.memory_space<vmem>>, vector<1x1x1x8x16xbf16>
      %9 = vector.shape_cast %8 : vector<1x1x1x8x16xbf16> to vector<8x16xbf16>
      %c0_8 = arith.constant 0 : index
      %c0_9 = arith.constant 0 : index
      %c0_10 = arith.constant 0 : index
      %10 = vector.load %arg3[%c0_8, %c0_9, %c0_10] : memref<16x16x32xbf16, #tpu.memory_space<vmem>>, vector<1x16x32xbf16>
      %11 = vector.shape_cast %10 : vector<1x16x32xbf16> to vector<16x32xbf16>
      %cst_11 = arith.constant dense<0.000000e+00> : vector<8x32xf32>
      %12 = tpu.matmul %9, %11, %cst_11 {dimension_numbers = #tpu.dot_dimension_numbers<[1], [0], [0], [1], [0, 0, 1, 1], [], []>} : vector<8x16xbf16>, vector<16x32xbf16>, vector<8x32xf32> -> vector<8x32xf32>
      %13 = arith.addf %5, %12 : vector<8x32xf32>
      %c0_i32_12 = arith.constant 0 : i32
      %14 = arith.addi %4, %c0_i32_12 : i32
      %c0_13 = arith.constant 0 : index
      %c1 = arith.constant 1 : index
      %15 = arith.index_cast %14 : i32 to index
      %c0_14 = arith.constant 0 : index
      %c0_15 = arith.constant 0 : index
      %16 = vector.load %arg2[%c0_13, %c1, %15, %c0_14, %c0_15] : memref<1x4x9x9x16xbf16, #tpu.memory_space<vmem>>, vector<1x1x1x8x16xbf16>
      %17 = vector.shape_cast %16 : vector<1x1x1x8x16xbf16> to vector<8x16xbf16>
      %c1_16 = arith.constant 1 : index
      %c0_17 = arith.constant 0 : index
      %c0_18 = arith.constant 0 : index
      %18 = vector.load %arg3[%c1_16, %c0_17, %c0_18] : memref<16x16x32xbf16, #tpu.memory_space<vmem>>, vector<1x16x32xbf16>
      %19 = vector.shape_cast %18 : vector<1x16x32xbf16> to vector<16x32xbf16>
      %cst_19 = arith.constant dense<0.000000e+00> : vector<8x32xf32>
      %20 = tpu.matmul %17, %19, %cst_19 {dimension_numbers = #tpu.dot_dimension_numbers<[1], [0], [0], [1], [0, 0, 1, 1], [], []>} : vector<8x16xbf16>, vector<16x32xbf16>, vector<8x32xf32> -> vector<8x32xf32>
      %21 = arith.addf %13, %20 : vector<8x32xf32>
      %c0_i32_20 = arith.constant 0 : i32
      %22 = arith.addi %4, %c0_i32_20 : i32
      %c0_21 = arith.constant 0 : index
      %c0_22 = arith.constant 0 : index
      %23 = arith.index_cast %22 : i32 to index
      %c1_23 = arith.constant 1 : index
      %c0_24 = arith.constant 0 : index
      %24 = vector.load %arg2[%c0_21, %c0_22, %23, %c1_23, %c0_24] : memref<1x4x9x9x16xbf16, #tpu.memory_space<vmem>>, vector<1x1x1x8x16xbf16>
      %25 = vector.shape_cast %24 : vector<1x1x1x8x16xbf16> to vector<8x16xbf16>
      %c2 = arith.constant 2 : index
      %c0_25 = arith.constant 0 : index
      %c0_26 = arith.constant 0 : index
      %26 = vector.load %arg3[%c2, %c0_25, %c0_26] : memref<16x16x32xbf16, #tpu.memory_space<vmem>>, vector<1x16x32xbf16>
      %27 = vector.shape_cast %26 : vector<1x16x32xbf16> to vector<16x32xbf16>
      %cst_27 = arith.constant dense<0.000000e+00> : vector<8x32xf32>
      %28 = tpu.matmul %25, %27, %cst_27 {dimension_numbers = #tpu.dot_dimension_numbers<[1], [0], [0], [1], [0, 0, 1, 1], [], []>} : vector<8x16xbf16>, vector<16x32xbf16>, vector<8x32xf32> -> vector<8x32xf32>
      %29 = arith.addf %21, %28 : vector<8x32xf32>
      %c0_i32_28 = arith.constant 0 : i32
      %30 = arith.addi %4, %c0_i32_28 : i32
      %c0_29 = arith.constant 0 : index
      %c1_30 = arith.constant 1 : index
      %31 = arith.index_cast %30 : i32 to index
      %c1_31 = arith.constant 1 : index
      %c0_32 = arith.constant 0 : index
      %32 = vector.load %arg2[%c0_29, %c1_30, %31, %c1_31, %c0_32] : memref<1x4x9x9x16xbf16, #tpu.memory_space<vmem>>, vector<1x1x1x8x16xbf16>
      %33 = vector.shape_cast %32 : vector<1x1x1x8x16xbf16> to vector<8x16xbf16>
      %c3 = arith.constant 3 : index
      %c0_33 = arith.constant 0 : index
      %c0_34 = arith.constant 0 : index
      %34 = vector.load %arg3[%c3, %c0_33, %c0_34] : memref<16x16x32xbf16, #tpu.memory_space<vmem>>, vector<1x16x32xbf16>
      %35 = vector.shape_cast %34 : vector<1x16x32xbf16> to vector<16x32xbf16>
      %cst_35 = arith.constant dense<0.000000e+00> : vector<8x32xf32>
      %36 = tpu.matmul %33, %35, %cst_35 {dimension_numbers = #tpu.dot_dimension_numbers<[1], [0], [0], [1], [0, 0, 1, 1], [], []>} : vector<8x16xbf16>, vector<16x32xbf16>, vector<8x32xf32> -> vector<8x32xf32>
      %37 = arith.addf %29, %36 : vector<8x32xf32>
      %c0_i32_36 = arith.constant 0 : i32
      %38 = arith.addi %4, %c0_i32_36 : i32
      %c0_37 = arith.constant 0 : index
      %c2_38 = arith.constant 2 : index
      %39 = arith.index_cast %38 : i32 to index
      %c0_39 = arith.constant 0 : index
      %c0_40 = arith.constant 0 : index
      %40 = vector.load %arg2[%c0_37, %c2_38, %39, %c0_39, %c0_40] : memref<1x4x9x9x16xbf16, #tpu.memory_space<vmem>>, vector<1x1x1x8x16xbf16>
      %41 = vector.shape_cast %40 : vector<1x1x1x8x16xbf16> to vector<8x16xbf16>
      %c4 = arith.constant 4 : index
      %c0_41 = arith.constant 0 : index
      %c0_42 = arith.constant 0 : index
      %42 = vector.load %arg3[%c4, %c0_41, %c0_42] : memref<16x16x32xbf16, #tpu.memory_space<vmem>>, vector<1x16x32xbf16>
      %43 = vector.shape_cast %42 : vector<1x16x32xbf16> to vector<16x32xbf16>
      %cst_43 = arith.constant dense<0.000000e+00> : vector<8x32xf32>
      %44 = tpu.matmul %41, %43, %cst_43 {dimension_numbers = #tpu.dot_dimension_numbers<[1], [0], [0], [1], [0, 0, 1, 1], [], []>} : vector<8x16xbf16>, vector<16x32xbf16>, vector<8x32xf32> -> vector<8x32xf32>
      %45 = arith.addf %37, %44 : vector<8x32xf32>
      %c0_i32_44 = arith.constant 0 : i32
      %46 = arith.addi %4, %c0_i32_44 : i32
      %c0_45 = arith.constant 0 : index
      %c3_46 = arith.constant 3 : index
      %47 = arith.index_cast %46 : i32 to index
      %c0_47 = arith.constant 0 : index
      %c0_48 = arith.constant 0 : index
      %48 = vector.load %arg2[%c0_45, %c3_46, %47, %c0_47, %c0_48] : memref<1x4x9x9x16xbf16, #tpu.memory_space<vmem>>, vector<1x1x1x8x16xbf16>
      %49 = vector.shape_cast %48 : vector<1x1x1x8x16xbf16> to vector<8x16xbf16>
      %c5 = arith.constant 5 : index
      %c0_49 = arith.constant 0 : index
      %c0_50 = arith.constant 0 : index
      %50 = vector.load %arg3[%c5, %c0_49, %c0_50] : memref<16x16x32xbf16, #tpu.memory_space<vmem>>, vector<1x16x32xbf16>
      %51 = vector.shape_cast %50 : vector<1x16x32xbf16> to vector<16x32xbf16>
      %cst_51 = arith.constant dense<0.000000e+00> : vector<8x32xf32>
      %52 = tpu.matmul %49, %51, %cst_51 {dimension_numbers = #tpu.dot_dimension_numbers<[1], [0], [0], [1], [0, 0, 1, 1], [], []>} : vector<8x16xbf16>, vector<16x32xbf16>, vector<8x32xf32> -> vector<8x32xf32>
      %53 = arith.addf %45, %52 : vector<8x32xf32>
      %c0_i32_52 = arith.constant 0 : i32
      %54 = arith.addi %4, %c0_i32_52 : i32
      %c0_53 = arith.constant 0 : index
      %c2_54 = arith.constant 2 : index
      %55 = arith.index_cast %54 : i32 to index
      %c1_55 = arith.constant 1 : index
      %c0_56 = arith.constant 0 : index
      %56 = vector.load %arg2[%c0_53, %c2_54, %55, %c1_55, %c0_56] : memref<1x4x9x9x16xbf16, #tpu.memory_space<vmem>>, vector<1x1x1x8x16xbf16>
      %57 = vector.shape_cast %56 : vector<1x1x1x8x16xbf16> to vector<8x16xbf16>
      %c6 = arith.constant 6 : index
      %c0_57 = arith.constant 0 : index
      %c0_58 = arith.constant 0 : index
      %58 = vector.load %arg3[%c6, %c0_57, %c0_58] : memref<16x16x32xbf16, #tpu.memory_space<vmem>>, vector<1x16x32xbf16>
      %59 = vector.shape_cast %58 : vector<1x16x32xbf16> to vector<16x32xbf16>
      %cst_59 = arith.constant dense<0.000000e+00> : vector<8x32xf32>
      %60 = tpu.matmul %57, %59, %cst_59 {dimension_numbers = #tpu.dot_dimension_numbers<[1], [0], [0], [1], [0, 0, 1, 1], [], []>} : vector<8x16xbf16>, vector<16x32xbf16>, vector<8x32xf32> -> vector<8x32xf32>
      %61 = arith.addf %53, %60 : vector<8x32xf32>
      %c0_i32_60 = arith.constant 0 : i32
      %62 = arith.addi %4, %c0_i32_60 : i32
      %c0_61 = arith.constant 0 : index
      %c3_62 = arith.constant 3 : index
      %63 = arith.index_cast %62 : i32 to index
      %c1_63 = arith.constant 1 : index
      %c0_64 = arith.constant 0 : index
      %64 = vector.load %arg2[%c0_61, %c3_62, %63, %c1_63, %c0_64] : memref<1x4x9x9x16xbf16, #tpu.memory_space<vmem>>, vector<1x1x1x8x16xbf16>
      %65 = vector.shape_cast %64 : vector<1x1x1x8x16xbf16> to vector<8x16xbf16>
      %c7 = arith.constant 7 : index
      %c0_65 = arith.constant 0 : index
      %c0_66 = arith.constant 0 : index
      %66 = vector.load %arg3[%c7, %c0_65, %c0_66] : memref<16x16x32xbf16, #tpu.memory_space<vmem>>, vector<1x16x32xbf16>
      %67 = vector.shape_cast %66 : vector<1x16x32xbf16> to vector<16x32xbf16>
      %cst_67 = arith.constant dense<0.000000e+00> : vector<8x32xf32>
      %68 = tpu.matmul %65, %67, %cst_67 {dimension_numbers = #tpu.dot_dimension_numbers<[1], [0], [0], [1], [0, 0, 1, 1], [], []>} : vector<8x16xbf16>, vector<16x32xbf16>, vector<8x32xf32> -> vector<8x32xf32>
      %69 = arith.addf %61, %68 : vector<8x32xf32>
      %c1_i32_68 = arith.constant 1 : i32
      %70 = arith.addi %4, %c1_i32_68 : i32
      %c0_69 = arith.constant 0 : index
      %c0_70 = arith.constant 0 : index
      %71 = arith.index_cast %70 : i32 to index
      %c0_71 = arith.constant 0 : index
      %c0_72 = arith.constant 0 : index
      %72 = vector.load %arg2[%c0_69, %c0_70, %71, %c0_71, %c0_72] : memref<1x4x9x9x16xbf16, #tpu.memory_space<vmem>>, vector<1x1x1x8x16xbf16>
      %73 = vector.shape_cast %72 : vector<1x1x1x8x16xbf16> to vector<8x16xbf16>
      %c8 = arith.constant 8 : index
      %c0_73 = arith.constant 0 : index
      %c0_74 = arith.constant 0 : index
      %74 = vector.load %arg3[%c8, %c0_73, %c0_74] : memref<16x16x32xbf16, #tpu.memory_space<vmem>>, vector<1x16x32xbf16>
      %75 = vector.shape_cast %74 : vector<1x16x32xbf16> to vector<16x32xbf16>
      %cst_75 = arith.constant dense<0.000000e+00> : vector<8x32xf32>
      %76 = tpu.matmul %73, %75, %cst_75 {dimension_numbers = #tpu.dot_dimension_numbers<[1], [0], [0], [1], [0, 0, 1, 1], [], []>} : vector<8x16xbf16>, vector<16x32xbf16>, vector<8x32xf32> -> vector<8x32xf32>
      %77 = arith.addf %69, %76 : vector<8x32xf32>
      %c1_i32_76 = arith.constant 1 : i32
      %78 = arith.addi %4, %c1_i32_76 : i32
      %c0_77 = arith.constant 0 : index
      %c1_78 = arith.constant 1 : index
      %79 = arith.index_cast %78 : i32 to index
      %c0_79 = arith.constant 0 : index
      %c0_80 = arith.constant 0 : index
      %80 = vector.load %arg2[%c0_77, %c1_78, %79, %c0_79, %c0_80] : memref<1x4x9x9x16xbf16, #tpu.memory_space<vmem>>, vector<1x1x1x8x16xbf16>
      %81 = vector.shape_cast %80 : vector<1x1x1x8x16xbf16> to vector<8x16xbf16>
      %c9 = arith.constant 9 : index
      %c0_81 = arith.constant 0 : index
      %c0_82 = arith.constant 0 : index
      %82 = vector.load %arg3[%c9, %c0_81, %c0_82] : memref<16x16x32xbf16, #tpu.memory_space<vmem>>, vector<1x16x32xbf16>
      %83 = vector.shape_cast %82 : vector<1x16x32xbf16> to vector<16x32xbf16>
      %cst_83 = arith.constant dense<0.000000e+00> : vector<8x32xf32>
      %84 = tpu.matmul %81, %83, %cst_83 {dimension_numbers = #tpu.dot_dimension_numbers<[1], [0], [0], [1], [0, 0, 1, 1], [], []>} : vector<8x16xbf16>, vector<16x32xbf16>, vector<8x32xf32> -> vector<8x32xf32>
      %85 = arith.addf %77, %84 : vector<8x32xf32>
      %c1_i32_84 = arith.constant 1 : i32
      %86 = arith.addi %4, %c1_i32_84 : i32
      %c0_85 = arith.constant 0 : index
      %c0_86 = arith.constant 0 : index
      %87 = arith.index_cast %86 : i32 to index
      %c1_87 = arith.constant 1 : index
      %c0_88 = arith.constant 0 : index
      %88 = vector.load %arg2[%c0_85, %c0_86, %87, %c1_87, %c0_88] : memref<1x4x9x9x16xbf16, #tpu.memory_space<vmem>>, vector<1x1x1x8x16xbf16>
      %89 = vector.shape_cast %88 : vector<1x1x1x8x16xbf16> to vector<8x16xbf16>
      %c10 = arith.constant 10 : index
      %c0_89 = arith.constant 0 : index
      %c0_90 = arith.constant 0 : index
      %90 = vector.load %arg3[%c10, %c0_89, %c0_90] : memref<16x16x32xbf16, #tpu.memory_space<vmem>>, vector<1x16x32xbf16>
      %91 = vector.shape_cast %90 : vector<1x16x32xbf16> to vector<16x32xbf16>
      %cst_91 = arith.constant dense<0.000000e+00> : vector<8x32xf32>
      %92 = tpu.matmul %89, %91, %cst_91 {dimension_numbers = #tpu.dot_dimension_numbers<[1], [0], [0], [1], [0, 0, 1, 1], [], []>} : vector<8x16xbf16>, vector<16x32xbf16>, vector<8x32xf32> -> vector<8x32xf32>
      %93 = arith.addf %85, %92 : vector<8x32xf32>
      %c1_i32_92 = arith.constant 1 : i32
      %94 = arith.addi %4, %c1_i32_92 : i32
      %c0_93 = arith.constant 0 : index
      %c1_94 = arith.constant 1 : index
      %95 = arith.index_cast %94 : i32 to index
      %c1_95 = arith.constant 1 : index
      %c0_96 = arith.constant 0 : index
      %96 = vector.load %arg2[%c0_93, %c1_94, %95, %c1_95, %c0_96] : memref<1x4x9x9x16xbf16, #tpu.memory_space<vmem>>, vector<1x1x1x8x16xbf16>
      %97 = vector.shape_cast %96 : vector<1x1x1x8x16xbf16> to vector<8x16xbf16>
      %c11 = arith.constant 11 : index
      %c0_97 = arith.constant 0 : index
      %c0_98 = arith.constant 0 : index
      %98 = vector.load %arg3[%c11, %c0_97, %c0_98] : memref<16x16x32xbf16, #tpu.memory_space<vmem>>, vector<1x16x32xbf16>
      %99 = vector.shape_cast %98 : vector<1x16x32xbf16> to vector<16x32xbf16>
      %cst_99 = arith.constant dense<0.000000e+00> : vector<8x32xf32>
      %100 = tpu.matmul %97, %99, %cst_99 {dimension_numbers = #tpu.dot_dimension_numbers<[1], [0], [0], [1], [0, 0, 1, 1], [], []>} : vector<8x16xbf16>, vector<16x32xbf16>, vector<8x32xf32> -> vector<8x32xf32>
      %101 = arith.addf %93, %100 : vector<8x32xf32>
      %c1_i32_100 = arith.constant 1 : i32
      %102 = arith.addi %4, %c1_i32_100 : i32
      %c0_101 = arith.constant 0 : index
      %c2_102 = arith.constant 2 : index
      %103 = arith.index_cast %102 : i32 to index
      %c0_103 = arith.constant 0 : index
      %c0_104 = arith.constant 0 : index
      %104 = vector.load %arg2[%c0_101, %c2_102, %103, %c0_103, %c0_104] : memref<1x4x9x9x16xbf16, #tpu.memory_space<vmem>>, vector<1x1x1x8x16xbf16>
      %105 = vector.shape_cast %104 : vector<1x1x1x8x16xbf16> to vector<8x16xbf16>
      %c12 = arith.constant 12 : index
      %c0_105 = arith.constant 0 : index
      %c0_106 = arith.constant 0 : index
      %106 = vector.load %arg3[%c12, %c0_105, %c0_106] : memref<16x16x32xbf16, #tpu.memory_space<vmem>>, vector<1x16x32xbf16>
      %107 = vector.shape_cast %106 : vector<1x16x32xbf16> to vector<16x32xbf16>
      %cst_107 = arith.constant dense<0.000000e+00> : vector<8x32xf32>
      %108 = tpu.matmul %105, %107, %cst_107 {dimension_numbers = #tpu.dot_dimension_numbers<[1], [0], [0], [1], [0, 0, 1, 1], [], []>} : vector<8x16xbf16>, vector<16x32xbf16>, vector<8x32xf32> -> vector<8x32xf32>
      %109 = arith.addf %101, %108 : vector<8x32xf32>
      %c1_i32_108 = arith.constant 1 : i32
      %110 = arith.addi %4, %c1_i32_108 : i32
      %c0_109 = arith.constant 0 : index
      %c3_110 = arith.constant 3 : index
      %111 = arith.index_cast %110 : i32 to index
      %c0_111 = arith.constant 0 : index
      %c0_112 = arith.constant 0 : index
      %112 = vector.load %arg2[%c0_109, %c3_110, %111, %c0_111, %c0_112] : memref<1x4x9x9x16xbf16, #tpu.memory_space<vmem>>, vector<1x1x1x8x16xbf16>
      %113 = vector.shape_cast %112 : vector<1x1x1x8x16xbf16> to vector<8x16xbf16>
      %c13 = arith.constant 13 : index
      %c0_113 = arith.constant 0 : index
      %c0_114 = arith.constant 0 : index
      %114 = vector.load %arg3[%c13, %c0_113, %c0_114] : memref<16x16x32xbf16, #tpu.memory_space<vmem>>, vector<1x16x32xbf16>
      %115 = vector.shape_cast %114 : vector<1x16x32xbf16> to vector<16x32xbf16>
      %cst_115 = arith.constant dense<0.000000e+00> : vector<8x32xf32>
      %116 = tpu.matmul %113, %115, %cst_115 {dimension_numbers = #tpu.dot_dimension_numbers<[1], [0], [0], [1], [0, 0, 1, 1], [], []>} : vector<8x16xbf16>, vector<16x32xbf16>, vector<8x32xf32> -> vector<8x32xf32>
      %117 = arith.addf %109, %116 : vector<8x32xf32>
      %c1_i32_116 = arith.constant 1 : i32
      %118 = arith.addi %4, %c1_i32_116 : i32
      %c0_117 = arith.constant 0 : index
      %c2_118 = arith.constant 2 : index
      %119 = arith.index_cast %118 : i32 to index
      %c1_119 = arith.constant 1 : index
      %c0_120 = arith.constant 0 : index
      %120 = vector.load %arg2[%c0_117, %c2_118, %119, %c1_119, %c0_120] : memref<1x4x9x9x16xbf16, #tpu.memory_space<vmem>>, vector<1x1x1x8x16xbf16>
      %121 = vector.shape_cast %120 : vector<1x1x1x8x16xbf16> to vector<8x16xbf16>
      %c14 = arith.constant 14 : index
      %c0_121 = arith.constant 0 : index
      %c0_122 = arith.constant 0 : index
      %122 = vector.load %arg3[%c14, %c0_121, %c0_122] : memref<16x16x32xbf16, #tpu.memory_space<vmem>>, vector<1x16x32xbf16>
      %123 = vector.shape_cast %122 : vector<1x16x32xbf16> to vector<16x32xbf16>
      %cst_123 = arith.constant dense<0.000000e+00> : vector<8x32xf32>
      %124 = tpu.matmul %121, %123, %cst_123 {dimension_numbers = #tpu.dot_dimension_numbers<[1], [0], [0], [1], [0, 0, 1, 1], [], []>} : vector<8x16xbf16>, vector<16x32xbf16>, vector<8x32xf32> -> vector<8x32xf32>
      %125 = arith.addf %117, %124 : vector<8x32xf32>
      %c1_i32_124 = arith.constant 1 : i32
      %126 = arith.addi %4, %c1_i32_124 : i32
      %c0_125 = arith.constant 0 : index
      %c3_126 = arith.constant 3 : index
      %127 = arith.index_cast %126 : i32 to index
      %c1_127 = arith.constant 1 : index
      %c0_128 = arith.constant 0 : index
      %128 = vector.load %arg2[%c0_125, %c3_126, %127, %c1_127, %c0_128] : memref<1x4x9x9x16xbf16, #tpu.memory_space<vmem>>, vector<1x1x1x8x16xbf16>
      %129 = vector.shape_cast %128 : vector<1x1x1x8x16xbf16> to vector<8x16xbf16>
      %c15 = arith.constant 15 : index
      %c0_129 = arith.constant 0 : index
      %c0_130 = arith.constant 0 : index
      %130 = vector.load %arg3[%c15, %c0_129, %c0_130] : memref<16x16x32xbf16, #tpu.memory_space<vmem>>, vector<1x16x32xbf16>
      %131 = vector.shape_cast %130 : vector<1x16x32xbf16> to vector<16x32xbf16>
      %cst_131 = arith.constant dense<0.000000e+00> : vector<8x32xf32>
      %132 = tpu.matmul %129, %131, %cst_131 {dimension_numbers = #tpu.dot_dimension_numbers<[1], [0], [0], [1], [0, 0, 1, 1], [], []>} : vector<8x16xbf16>, vector<16x32xbf16>, vector<8x32xf32> -> vector<8x32xf32>
      %133 = arith.addf %125, %132 : vector<8x32xf32>
      %c0_132 = arith.constant 0 : index
      %c0_133 = arith.constant 0 : index
      %134 = vector.load %arg4[%c0_132, %c0_133] : memref<1x32xf32, #tpu.memory_space<vmem>>, vector<1x32xf32>
      %135 = vector.broadcast %134 : vector<1x32xf32> to vector<8x32xf32>
      %136 = arith.addf %133, %135 : vector<8x32xf32>
      %cst_134 = arith.constant 0.000000e+00 : f32
      %137 = vector.broadcast %cst_134 : f32 to vector<8x32xf32>
      %138 = arith.cmpf oge, %136, %137 : vector<8x32xf32>
      %cst_135 = arith.constant 2.000000e-01 : f32
      %139 = vector.broadcast %cst_135 : f32 to vector<8x32xf32>
      %140 = arith.mulf %136, %139 : vector<8x32xf32>
      %141 = arith.select %138, %136, %140 : vector<8x32xi1>, vector<8x32xf32>
      %142 = arith.truncf %141 : vector<8x32xf32> to vector<8x32xbf16>
      %c0_136 = arith.constant 0 : index
      %143 = arith.index_cast %2 : i32 to index
      %c0_137 = arith.constant 0 : index
      %c0_138 = arith.constant 0 : index
      %144 = vector.load %arg5[%c0_136, %143, %c0_137, %c0_138] : memref<1x8x8x32xbf16, #tpu.memory_space<vmem>>, vector<1x1x8x32xbf16>
      %145 = vector.shape_cast %144 : vector<1x1x8x32xbf16> to vector<8x32xbf16>
      %146 = vector.shape_cast %142 : vector<8x32xbf16> to vector<1x1x8x32xbf16>
      tpu.vector_store %arg5[%c0_136, %143, %c0_137, %c0_138], %146 {strides = array<i32>} : memref<1x8x8x32xbf16, #tpu.memory_space<vmem>>, vector<1x1x8x32xbf16>,
    }
    %c8_i32_0 = arith.constant 8 : i32
    return
  }
  func.func @transform_0(%arg0: i32, %arg1: i32) -> (i32, i32, i32, i32, i32) {
    %c0_i32 = arith.constant 0 : i32
    %c0_i32_0 = arith.constant 0 : i32
    %c0_i32_1 = arith.constant 0 : i32
    %c0_i32_2 = arith.constant 0 : i32
    %c0_i32_3 = arith.constant 0 : i32
    return %arg0, %c0_i32, %c0_i32_0, %c0_i32_1, %c0_i32_2 : i32, i32, i32, i32, i32
  }
  func.func @transform_1(%arg0: i32, %arg1: i32) -> (i32, i32, i32) {
    %c0_i32 = arith.constant 0 : i32
    %c0_i32_0 = arith.constant 0 : i32
    %c0_i32_1 = arith.constant 0 : i32
    %c0_i32_2 = arith.constant 0 : i32
    return %c0_i32, %c0_i32_0, %c0_i32_1 : i32, i32, i32
  }
  func.func @transform_2(%arg0: i32, %arg1: i32) -> (i32, i32) {
    %c0_i32 = arith.constant 0 : i32
    %c0_i32_0 = arith.constant 0 : i32
    %c0_i32_1 = arith.constant 0 : i32
    return %c0_i32, %c0_i32_0 : i32, i32
  }
  func.func @transform_3(%arg0: i32, %arg1: i32) -> (i32, i32, i32, i32) {
    %c0_i32 = arith.constant 0 : i32
    %c0_i32_0 = arith.constant 0 : i32
    %c0_i32_1 = arith.constant 0 : i32
    return %arg0, %arg1, %c0_i32, %c0_i32_0 : i32, i32, i32, i32
  }
}

module attributes {stable_mosaic.version = 11 : i64} {
  func.func @_fused_conv_kernel(%arg0: i32, %arg1: i32, %arg2: memref<1x4x5x5x32xbf16, #tpu.memory_space<vmem>>, %arg3: memref<16x32x64xbf16, #tpu.memory_space<vmem>>, %arg4: memref<1x64xf32, #tpu.memory_space<vmem>>, %arg5: memref<1x4x4x64xbf16, #tpu.memory_space<vmem>>) attributes {dimension_semantics = [#tpu.dimension_semantics<parallel>, #tpu.dimension_semantics<parallel>], iteration_bounds = array<i64: 2, 1>, scalar_prefetch = 0 : i64, scratch_operands = 0 : i64, tpu.core_type = #tpu.core_type<tc>, window_params = [{transform_indices = @transform_0, window_bounds = array<i64: 1, 4, 5, 5, 32>}, {pipeline_mode = #tpu.pipeline_mode<synchronous>, transform_indices = @transform_1, window_bounds = array<i64: 16, 32, 64>}, {pipeline_mode = #tpu.pipeline_mode<synchronous>, transform_indices = @transform_2, window_bounds = array<i64: 1, 64>}, {transform_indices = @transform_3, window_bounds = array<i64: 1, 4, 4, 64>}]} {
    %c0_i32 = arith.constant 0 : i32
    %c4_i32 = arith.constant 4 : i32
    %0 = arith.addi %c0_i32, %c4_i32 : i32
    %c1_i32 = arith.constant 1 : i32
    scf.for %arg6 = %c0_i32 to %0 step %c1_i32  : i32 {
      %c1_i32_1 = arith.constant 1 : i32
      %1 = arith.muli %arg6, %c1_i32_1 : i32
      %c0_i32_2 = arith.constant 0 : i32
      %2 = arith.addi %c0_i32_2, %1 : i32
      %c4_i32_3 = arith.constant 4 : i32
      %3 = arith.muli %arg1, %c4_i32_3 : i32
      %4 = arith.addi %3, %2 : i32
      %cst = arith.constant 0.000000e+00 : f32
      %5 = vector.broadcast %cst : f32 to vector<4x64xf32>
      %c0_i32_4 = arith.constant 0 : i32
      %6 = arith.addi %4, %c0_i32_4 : i32
      %c0 = arith.constant 0 : index
      %c0_5 = arith.constant 0 : index
      %7 = arith.index_cast %6 : i32 to index
      %c0_6 = arith.constant 0 : index
      %c0_7 = arith.constant 0 : index
      %8 = vector.load %arg2[%c0, %c0_5, %7, %c0_6, %c0_7] : memref<1x4x5x5x32xbf16, #tpu.memory_space<vmem>>, vector<1x1x1x4x32xbf16>
      %9 = vector.shape_cast %8 : vector<1x1x1x4x32xbf16> to vector<4x32xbf16>
      %c0_8 = arith.constant 0 : index
      %c0_9 = arith.constant 0 : index
      %c0_10 = arith.constant 0 : index
      %10 = vector.load %arg3[%c0_8, %c0_9, %c0_10] : memref<16x32x64xbf16, #tpu.memory_space<vmem>>, vector<1x32x64xbf16>
      %11 = vector.shape_cast %10 : vector<1x32x64xbf16> to vector<32x64xbf16>
      %cst_11 = arith.constant dense<0.000000e+00> : vector<4x64xf32>
      %12 = tpu.matmul %9, %11, %cst_11 {dimension_numbers = #tpu.dot_dimension_numbers<[1], [0], [0], [1], [0, 0, 1, 1], [], []>} : vector<4x32xbf16>, vector<32x64xbf16>, vector<4x64xf32> -> vector<4x64xf32>
      %13 = arith.addf %5, %12 : vector<4x64xf32>
      %c0_i32_12 = arith.constant 0 : i32
      %14 = arith.addi %4, %c0_i32_12 : i32
      %c0_13 = arith.constant 0 : index
      %c1 = arith.constant 1 : index
      %15 = arith.index_cast %14 : i32 to index
      %c0_14 = arith.constant 0 : index
      %c0_15 = arith.constant 0 : index
      %16 = vector.load %arg2[%c0_13, %c1, %15, %c0_14, %c0_15] : memref<1x4x5x5x32xbf16, #tpu.memory_space<vmem>>, vector<1x1x1x4x32xbf16>
      %17 = vector.shape_cast %16 : vector<1x1x1x4x32xbf16> to vector<4x32xbf16>
      %c1_16 = arith.constant 1 : index
      %c0_17 = arith.constant 0 : index
      %c0_18 = arith.constant 0 : index
      %18 = vector.load %arg3[%c1_16, %c0_17, %c0_18] : memref<16x32x64xbf16, #tpu.memory_space<vmem>>, vector<1x32x64xbf16>
      %19 = vector.shape_cast %18 : vector<1x32x64xbf16> to vector<32x64xbf16>
      %cst_19 = arith.constant dense<0.000000e+00> : vector<4x64xf32>
      %20 = tpu.matmul %17, %19, %cst_19 {dimension_numbers = #tpu.dot_dimension_numbers<[1], [0], [0], [1], [0, 0, 1, 1], [], []>} : vector<4x32xbf16>, vector<32x64xbf16>, vector<4x64xf32> -> vector<4x64xf32>
      %21 = arith.addf %13, %20 : vector<4x64xf32>
      %c0_i32_20 = arith.constant 0 : i32
      %22 = arith.addi %4, %c0_i32_20 : i32
      %c0_21 = arith.constant 0 : index
      %c0_22 = arith.constant 0 : index
      %23 = arith.index_cast %22 : i32 to index
      %c1_23 = arith.constant 1 : index
      %c0_24 = arith.constant 0 : index
      %24 = vector.load %arg2[%c0_21, %c0_22, %23, %c1_23, %c0_24] : memref<1x4x5x5x32xbf16, #tpu.memory_space<vmem>>, vector<1x1x1x4x32xbf16>
      %25 = vector.shape_cast %24 : vector<1x1x1x4x32xbf16> to vector<4x32xbf16>
      %c2 = arith.constant 2 : index
      %c0_25 = arith.constant 0 : index
      %c0_26 = arith.constant 0 : index
      %26 = vector.load %arg3[%c2, %c0_25, %c0_26] : memref<16x32x64xbf16, #tpu.memory_space<vmem>>, vector<1x32x64xbf16>
      %27 = vector.shape_cast %26 : vector<1x32x64xbf16> to vector<32x64xbf16>
      %cst_27 = arith.constant dense<0.000000e+00> : vector<4x64xf32>
      %28 = tpu.matmul %25, %27, %cst_27 {dimension_numbers = #tpu.dot_dimension_numbers<[1], [0], [0], [1], [0, 0, 1, 1], [], []>} : vector<4x32xbf16>, vector<32x64xbf16>, vector<4x64xf32> -> vector<4x64xf32>
      %29 = arith.addf %21, %28 : vector<4x64xf32>
      %c0_i32_28 = arith.constant 0 : i32
      %30 = arith.addi %4, %c0_i32_28 : i32
      %c0_29 = arith.constant 0 : index
      %c1_30 = arith.constant 1 : index
      %31 = arith.index_cast %30 : i32 to index
      %c1_31 = arith.constant 1 : index
      %c0_32 = arith.constant 0 : index
      %32 = vector.load %arg2[%c0_29, %c1_30, %31, %c1_31, %c0_32] : memref<1x4x5x5x32xbf16, #tpu.memory_space<vmem>>, vector<1x1x1x4x32xbf16>
      %33 = vector.shape_cast %32 : vector<1x1x1x4x32xbf16> to vector<4x32xbf16>
      %c3 = arith.constant 3 : index
      %c0_33 = arith.constant 0 : index
      %c0_34 = arith.constant 0 : index
      %34 = vector.load %arg3[%c3, %c0_33, %c0_34] : memref<16x32x64xbf16, #tpu.memory_space<vmem>>, vector<1x32x64xbf16>
      %35 = vector.shape_cast %34 : vector<1x32x64xbf16> to vector<32x64xbf16>
      %cst_35 = arith.constant dense<0.000000e+00> : vector<4x64xf32>
      %36 = tpu.matmul %33, %35, %cst_35 {dimension_numbers = #tpu.dot_dimension_numbers<[1], [0], [0], [1], [0, 0, 1, 1], [], []>} : vector<4x32xbf16>, vector<32x64xbf16>, vector<4x64xf32> -> vector<4x64xf32>
      %37 = arith.addf %29, %36 : vector<4x64xf32>
      %c0_i32_36 = arith.constant 0 : i32
      %38 = arith.addi %4, %c0_i32_36 : i32
      %c0_37 = arith.constant 0 : index
      %c2_38 = arith.constant 2 : index
      %39 = arith.index_cast %38 : i32 to index
      %c0_39 = arith.constant 0 : index
      %c0_40 = arith.constant 0 : index
      %40 = vector.load %arg2[%c0_37, %c2_38, %39, %c0_39, %c0_40] : memref<1x4x5x5x32xbf16, #tpu.memory_space<vmem>>, vector<1x1x1x4x32xbf16>
      %41 = vector.shape_cast %40 : vector<1x1x1x4x32xbf16> to vector<4x32xbf16>
      %c4 = arith.constant 4 : index
      %c0_41 = arith.constant 0 : index
      %c0_42 = arith.constant 0 : index
      %42 = vector.load %arg3[%c4, %c0_41, %c0_42] : memref<16x32x64xbf16, #tpu.memory_space<vmem>>, vector<1x32x64xbf16>
      %43 = vector.shape_cast %42 : vector<1x32x64xbf16> to vector<32x64xbf16>
      %cst_43 = arith.constant dense<0.000000e+00> : vector<4x64xf32>
      %44 = tpu.matmul %41, %43, %cst_43 {dimension_numbers = #tpu.dot_dimension_numbers<[1], [0], [0], [1], [0, 0, 1, 1], [], []>} : vector<4x32xbf16>, vector<32x64xbf16>, vector<4x64xf32> -> vector<4x64xf32>
      %45 = arith.addf %37, %44 : vector<4x64xf32>
      %c0_i32_44 = arith.constant 0 : i32
      %46 = arith.addi %4, %c0_i32_44 : i32
      %c0_45 = arith.constant 0 : index
      %c3_46 = arith.constant 3 : index
      %47 = arith.index_cast %46 : i32 to index
      %c0_47 = arith.constant 0 : index
      %c0_48 = arith.constant 0 : index
      %48 = vector.load %arg2[%c0_45, %c3_46, %47, %c0_47, %c0_48] : memref<1x4x5x5x32xbf16, #tpu.memory_space<vmem>>, vector<1x1x1x4x32xbf16>
      %49 = vector.shape_cast %48 : vector<1x1x1x4x32xbf16> to vector<4x32xbf16>
      %c5 = arith.constant 5 : index
      %c0_49 = arith.constant 0 : index
      %c0_50 = arith.constant 0 : index
      %50 = vector.load %arg3[%c5, %c0_49, %c0_50] : memref<16x32x64xbf16, #tpu.memory_space<vmem>>, vector<1x32x64xbf16>
      %51 = vector.shape_cast %50 : vector<1x32x64xbf16> to vector<32x64xbf16>
      %cst_51 = arith.constant dense<0.000000e+00> : vector<4x64xf32>
      %52 = tpu.matmul %49, %51, %cst_51 {dimension_numbers = #tpu.dot_dimension_numbers<[1], [0], [0], [1], [0, 0, 1, 1], [], []>} : vector<4x32xbf16>, vector<32x64xbf16>, vector<4x64xf32> -> vector<4x64xf32>
      %53 = arith.addf %45, %52 : vector<4x64xf32>
      %c0_i32_52 = arith.constant 0 : i32
      %54 = arith.addi %4, %c0_i32_52 : i32
      %c0_53 = arith.constant 0 : index
      %c2_54 = arith.constant 2 : index
      %55 = arith.index_cast %54 : i32 to index
      %c1_55 = arith.constant 1 : index
      %c0_56 = arith.constant 0 : index
      %56 = vector.load %arg2[%c0_53, %c2_54, %55, %c1_55, %c0_56] : memref<1x4x5x5x32xbf16, #tpu.memory_space<vmem>>, vector<1x1x1x4x32xbf16>
      %57 = vector.shape_cast %56 : vector<1x1x1x4x32xbf16> to vector<4x32xbf16>
      %c6 = arith.constant 6 : index
      %c0_57 = arith.constant 0 : index
      %c0_58 = arith.constant 0 : index
      %58 = vector.load %arg3[%c6, %c0_57, %c0_58] : memref<16x32x64xbf16, #tpu.memory_space<vmem>>, vector<1x32x64xbf16>
      %59 = vector.shape_cast %58 : vector<1x32x64xbf16> to vector<32x64xbf16>
      %cst_59 = arith.constant dense<0.000000e+00> : vector<4x64xf32>
      %60 = tpu.matmul %57, %59, %cst_59 {dimension_numbers = #tpu.dot_dimension_numbers<[1], [0], [0], [1], [0, 0, 1, 1], [], []>} : vector<4x32xbf16>, vector<32x64xbf16>, vector<4x64xf32> -> vector<4x64xf32>
      %61 = arith.addf %53, %60 : vector<4x64xf32>
      %c0_i32_60 = arith.constant 0 : i32
      %62 = arith.addi %4, %c0_i32_60 : i32
      %c0_61 = arith.constant 0 : index
      %c3_62 = arith.constant 3 : index
      %63 = arith.index_cast %62 : i32 to index
      %c1_63 = arith.constant 1 : index
      %c0_64 = arith.constant 0 : index
      %64 = vector.load %arg2[%c0_61, %c3_62, %63, %c1_63, %c0_64] : memref<1x4x5x5x32xbf16, #tpu.memory_space<vmem>>, vector<1x1x1x4x32xbf16>
      %65 = vector.shape_cast %64 : vector<1x1x1x4x32xbf16> to vector<4x32xbf16>
      %c7 = arith.constant 7 : index
      %c0_65 = arith.constant 0 : index
      %c0_66 = arith.constant 0 : index
      %66 = vector.load %arg3[%c7, %c0_65, %c0_66] : memref<16x32x64xbf16, #tpu.memory_space<vmem>>, vector<1x32x64xbf16>
      %67 = vector.shape_cast %66 : vector<1x32x64xbf16> to vector<32x64xbf16>
      %cst_67 = arith.constant dense<0.000000e+00> : vector<4x64xf32>
      %68 = tpu.matmul %65, %67, %cst_67 {dimension_numbers = #tpu.dot_dimension_numbers<[1], [0], [0], [1], [0, 0, 1, 1], [], []>} : vector<4x32xbf16>, vector<32x64xbf16>, vector<4x64xf32> -> vector<4x64xf32>
      %69 = arith.addf %61, %68 : vector<4x64xf32>
      %c1_i32_68 = arith.constant 1 : i32
      %70 = arith.addi %4, %c1_i32_68 : i32
      %c0_69 = arith.constant 0 : index
      %c0_70 = arith.constant 0 : index
      %71 = arith.index_cast %70 : i32 to index
      %c0_71 = arith.constant 0 : index
      %c0_72 = arith.constant 0 : index
      %72 = vector.load %arg2[%c0_69, %c0_70, %71, %c0_71, %c0_72] : memref<1x4x5x5x32xbf16, #tpu.memory_space<vmem>>, vector<1x1x1x4x32xbf16>
      %73 = vector.shape_cast %72 : vector<1x1x1x4x32xbf16> to vector<4x32xbf16>
      %c8 = arith.constant 8 : index
      %c0_73 = arith.constant 0 : index
      %c0_74 = arith.constant 0 : index
      %74 = vector.load %arg3[%c8, %c0_73, %c0_74] : memref<16x32x64xbf16, #tpu.memory_space<vmem>>, vector<1x32x64xbf16>
      %75 = vector.shape_cast %74 : vector<1x32x64xbf16> to vector<32x64xbf16>
      %cst_75 = arith.constant dense<0.000000e+00> : vector<4x64xf32>
      %76 = tpu.matmul %73, %75, %cst_75 {dimension_numbers = #tpu.dot_dimension_numbers<[1], [0], [0], [1], [0, 0, 1, 1], [], []>} : vector<4x32xbf16>, vector<32x64xbf16>, vector<4x64xf32> -> vector<4x64xf32>
      %77 = arith.addf %69, %76 : vector<4x64xf32>
      %c1_i32_76 = arith.constant 1 : i32
      %78 = arith.addi %4, %c1_i32_76 : i32
      %c0_77 = arith.constant 0 : index
      %c1_78 = arith.constant 1 : index
      %79 = arith.index_cast %78 : i32 to index
      %c0_79 = arith.constant 0 : index
      %c0_80 = arith.constant 0 : index
      %80 = vector.load %arg2[%c0_77, %c1_78, %79, %c0_79, %c0_80] : memref<1x4x5x5x32xbf16, #tpu.memory_space<vmem>>, vector<1x1x1x4x32xbf16>
      %81 = vector.shape_cast %80 : vector<1x1x1x4x32xbf16> to vector<4x32xbf16>
      %c9 = arith.constant 9 : index
      %c0_81 = arith.constant 0 : index
      %c0_82 = arith.constant 0 : index
      %82 = vector.load %arg3[%c9, %c0_81, %c0_82] : memref<16x32x64xbf16, #tpu.memory_space<vmem>>, vector<1x32x64xbf16>
      %83 = vector.shape_cast %82 : vector<1x32x64xbf16> to vector<32x64xbf16>
      %cst_83 = arith.constant dense<0.000000e+00> : vector<4x64xf32>
      %84 = tpu.matmul %81, %83, %cst_83 {dimension_numbers = #tpu.dot_dimension_numbers<[1], [0], [0], [1], [0, 0, 1, 1], [], []>} : vector<4x32xbf16>, vector<32x64xbf16>, vector<4x64xf32> -> vector<4x64xf32>
      %85 = arith.addf %77, %84 : vector<4x64xf32>
      %c1_i32_84 = arith.constant 1 : i32
      %86 = arith.addi %4, %c1_i32_84 : i32
      %c0_85 = arith.constant 0 : index
      %c0_86 = arith.constant 0 : index
      %87 = arith.index_cast %86 : i32 to index
      %c1_87 = arith.constant 1 : index
      %c0_88 = arith.constant 0 : index
      %88 = vector.load %arg2[%c0_85, %c0_86, %87, %c1_87, %c0_88] : memref<1x4x5x5x32xbf16, #tpu.memory_space<vmem>>, vector<1x1x1x4x32xbf16>
      %89 = vector.shape_cast %88 : vector<1x1x1x4x32xbf16> to vector<4x32xbf16>
      %c10 = arith.constant 10 : index
      %c0_89 = arith.constant 0 : index
      %c0_90 = arith.constant 0 : index
      %90 = vector.load %arg3[%c10, %c0_89, %c0_90] : memref<16x32x64xbf16, #tpu.memory_space<vmem>>, vector<1x32x64xbf16>
      %91 = vector.shape_cast %90 : vector<1x32x64xbf16> to vector<32x64xbf16>
      %cst_91 = arith.constant dense<0.000000e+00> : vector<4x64xf32>
      %92 = tpu.matmul %89, %91, %cst_91 {dimension_numbers = #tpu.dot_dimension_numbers<[1], [0], [0], [1], [0, 0, 1, 1], [], []>} : vector<4x32xbf16>, vector<32x64xbf16>, vector<4x64xf32> -> vector<4x64xf32>
      %93 = arith.addf %85, %92 : vector<4x64xf32>
      %c1_i32_92 = arith.constant 1 : i32
      %94 = arith.addi %4, %c1_i32_92 : i32
      %c0_93 = arith.constant 0 : index
      %c1_94 = arith.constant 1 : index
      %95 = arith.index_cast %94 : i32 to index
      %c1_95 = arith.constant 1 : index
      %c0_96 = arith.constant 0 : index
      %96 = vector.load %arg2[%c0_93, %c1_94, %95, %c1_95, %c0_96] : memref<1x4x5x5x32xbf16, #tpu.memory_space<vmem>>, vector<1x1x1x4x32xbf16>
      %97 = vector.shape_cast %96 : vector<1x1x1x4x32xbf16> to vector<4x32xbf16>
      %c11 = arith.constant 11 : index
      %c0_97 = arith.constant 0 : index
      %c0_98 = arith.constant 0 : index
      %98 = vector.load %arg3[%c11, %c0_97, %c0_98] : memref<16x32x64xbf16, #tpu.memory_space<vmem>>, vector<1x32x64xbf16>
      %99 = vector.shape_cast %98 : vector<1x32x64xbf16> to vector<32x64xbf16>
      %cst_99 = arith.constant dense<0.000000e+00> : vector<4x64xf32>
      %100 = tpu.matmul %97, %99, %cst_99 {dimension_numbers = #tpu.dot_dimension_numbers<[1], [0], [0], [1], [0, 0, 1, 1], [], []>} : vector<4x32xbf16>, vector<32x64xbf16>, vector<4x64xf32> -> vector<4x64xf32>
      %101 = arith.addf %93, %100 : vector<4x64xf32>
      %c1_i32_100 = arith.constant 1 : i32
      %102 = arith.addi %4, %c1_i32_100 : i32
      %c0_101 = arith.constant 0 : index
      %c2_102 = arith.constant 2 : index
      %103 = arith.index_cast %102 : i32 to index
      %c0_103 = arith.constant 0 : index
      %c0_104 = arith.constant 0 : index
      %104 = vector.load %arg2[%c0_101, %c2_102, %103, %c0_103, %c0_104] : memref<1x4x5x5x32xbf16, #tpu.memory_space<vmem>>, vector<1x1x1x4x32xbf16>
      %105 = vector.shape_cast %104 : vector<1x1x1x4x32xbf16> to vector<4x32xbf16>
      %c12 = arith.constant 12 : index
      %c0_105 = arith.constant 0 : index
      %c0_106 = arith.constant 0 : index
      %106 = vector.load %arg3[%c12, %c0_105, %c0_106] : memref<16x32x64xbf16, #tpu.memory_space<vmem>>, vector<1x32x64xbf16>
      %107 = vector.shape_cast %106 : vector<1x32x64xbf16> to vector<32x64xbf16>
      %cst_107 = arith.constant dense<0.000000e+00> : vector<4x64xf32>
      %108 = tpu.matmul %105, %107, %cst_107 {dimension_numbers = #tpu.dot_dimension_numbers<[1], [0], [0], [1], [0, 0, 1, 1], [], []>} : vector<4x32xbf16>, vector<32x64xbf16>, vector<4x64xf32> -> vector<4x64xf32>
      %109 = arith.addf %101, %108 : vector<4x64xf32>
      %c1_i32_108 = arith.constant 1 : i32
      %110 = arith.addi %4, %c1_i32_108 : i32
      %c0_109 = arith.constant 0 : index
      %c3_110 = arith.constant 3 : index
      %111 = arith.index_cast %110 : i32 to index
      %c0_111 = arith.constant 0 : index
      %c0_112 = arith.constant 0 : index
      %112 = vector.load %arg2[%c0_109, %c3_110, %111, %c0_111, %c0_112] : memref<1x4x5x5x32xbf16, #tpu.memory_space<vmem>>, vector<1x1x1x4x32xbf16>
      %113 = vector.shape_cast %112 : vector<1x1x1x4x32xbf16> to vector<4x32xbf16>
      %c13 = arith.constant 13 : index
      %c0_113 = arith.constant 0 : index
      %c0_114 = arith.constant 0 : index
      %114 = vector.load %arg3[%c13, %c0_113, %c0_114] : memref<16x32x64xbf16, #tpu.memory_space<vmem>>, vector<1x32x64xbf16>
      %115 = vector.shape_cast %114 : vector<1x32x64xbf16> to vector<32x64xbf16>
      %cst_115 = arith.constant dense<0.000000e+00> : vector<4x64xf32>
      %116 = tpu.matmul %113, %115, %cst_115 {dimension_numbers = #tpu.dot_dimension_numbers<[1], [0], [0], [1], [0, 0, 1, 1], [], []>} : vector<4x32xbf16>, vector<32x64xbf16>, vector<4x64xf32> -> vector<4x64xf32>
      %117 = arith.addf %109, %116 : vector<4x64xf32>
      %c1_i32_116 = arith.constant 1 : i32
      %118 = arith.addi %4, %c1_i32_116 : i32
      %c0_117 = arith.constant 0 : index
      %c2_118 = arith.constant 2 : index
      %119 = arith.index_cast %118 : i32 to index
      %c1_119 = arith.constant 1 : index
      %c0_120 = arith.constant 0 : index
      %120 = vector.load %arg2[%c0_117, %c2_118, %119, %c1_119, %c0_120] : memref<1x4x5x5x32xbf16, #tpu.memory_space<vmem>>, vector<1x1x1x4x32xbf16>
      %121 = vector.shape_cast %120 : vector<1x1x1x4x32xbf16> to vector<4x32xbf16>
      %c14 = arith.constant 14 : index
      %c0_121 = arith.constant 0 : index
      %c0_122 = arith.constant 0 : index
      %122 = vector.load %arg3[%c14, %c0_121, %c0_122] : memref<16x32x64xbf16, #tpu.memory_space<vmem>>, vector<1x32x64xbf16>
      %123 = vector.shape_cast %122 : vector<1x32x64xbf16> to vector<32x64xbf16>
      %cst_123 = arith.constant dense<0.000000e+00> : vector<4x64xf32>
      %124 = tpu.matmul %121, %123, %cst_123 {dimension_numbers = #tpu.dot_dimension_numbers<[1], [0], [0], [1], [0, 0, 1, 1], [], []>} : vector<4x32xbf16>, vector<32x64xbf16>, vector<4x64xf32> -> vector<4x64xf32>
      %125 = arith.addf %117, %124 : vector<4x64xf32>
      %c1_i32_124 = arith.constant 1 : i32
      %126 = arith.addi %4, %c1_i32_124 : i32
      %c0_125 = arith.constant 0 : index
      %c3_126 = arith.constant 3 : index
      %127 = arith.index_cast %126 : i32 to index
      %c1_127 = arith.constant 1 : index
      %c0_128 = arith.constant 0 : index
      %128 = vector.load %arg2[%c0_125, %c3_126, %127, %c1_127, %c0_128] : memref<1x4x5x5x32xbf16, #tpu.memory_space<vmem>>, vector<1x1x1x4x32xbf16>
      %129 = vector.shape_cast %128 : vector<1x1x1x4x32xbf16> to vector<4x32xbf16>
      %c15 = arith.constant 15 : index
      %c0_129 = arith.constant 0 : index
      %c0_130 = arith.constant 0 : index
      %130 = vector.load %arg3[%c15, %c0_129, %c0_130] : memref<16x32x64xbf16, #tpu.memory_space<vmem>>, vector<1x32x64xbf16>
      %131 = vector.shape_cast %130 : vector<1x32x64xbf16> to vector<32x64xbf16>
      %cst_131 = arith.constant dense<0.000000e+00> : vector<4x64xf32>
      %132 = tpu.matmul %129, %131, %cst_131 {dimension_numbers = #tpu.dot_dimension_numbers<[1], [0], [0], [1], [0, 0, 1, 1], [], []>} : vector<4x32xbf16>, vector<32x64xbf16>, vector<4x64xf32> -> vector<4x64xf32>
      %133 = arith.addf %125, %132 : vector<4x64xf32>
      %c0_132 = arith.constant 0 : index
      %c0_133 = arith.constant 0 : index
      %134 = vector.load %arg4[%c0_132, %c0_133] : memref<1x64xf32, #tpu.memory_space<vmem>>, vector<1x64xf32>
      %135 = vector.broadcast %134 : vector<1x64xf32> to vector<4x64xf32>
      %136 = arith.addf %133, %135 : vector<4x64xf32>
      %cst_134 = arith.constant 0.000000e+00 : f32
      %137 = vector.broadcast %cst_134 : f32 to vector<4x64xf32>
      %138 = arith.cmpf oge, %136, %137 : vector<4x64xf32>
      %cst_135 = arith.constant 2.000000e-01 : f32
      %139 = vector.broadcast %cst_135 : f32 to vector<4x64xf32>
      %140 = arith.mulf %136, %139 : vector<4x64xf32>
      %141 = arith.select %138, %136, %140 : vector<4x64xi1>, vector<4x64xf32>
      %142 = arith.truncf %141 : vector<4x64xf32> to vector<4x64xbf16>
      %c0_136 = arith.constant 0 : index
      %143 = arith.index_cast %2 : i32 to index
      %c0_137 = arith.constant 0 : index
      %c0_138 = arith.constant 0 : index
      %144 = vector.load %arg5[%c0_136, %143, %c0_137, %c0_138] : memref<1x4x4x64xbf16, #tpu.memory_space<vmem>>, vector<1x1x4x64xbf16>
      %145 = vector.shape_cast %144 : vector<1x1x4x64xbf16> to vector<4x64xbf16>
      %146 = vector.shape_cast %142 : vector<4x64xbf16> to vector<1x1x4x64xbf16>
      tpu.vector_store %arg5[%c0_136, %143, %c0_137, %c0_138], %146 {strides = array<i32>} : memref<1x4x4x64xbf16, #tpu.memory_space<vmem>>, vector<1x1x4x64xbf16>,
    }
    %c4_i32_0 = arith.constant 4 : i32
    return
  }
  func.func @transform_0(%arg0: i32, %arg1: i32) -> (i32, i32, i32, i32, i32) {
    %c0_i32 = arith.constant 0 : i32
    %c0_i32_0 = arith.constant 0 : i32
    %c0_i32_1 = arith.constant 0 : i32
    %c0_i32_2 = arith.constant 0 : i32
    %c0_i32_3 = arith.constant 0 : i32
    return %arg0, %c0_i32, %c0_i32_0, %c0_i32_1, %c0_i32_2 : i32, i32, i32, i32, i32
  }
  func.func @transform_1(%arg0: i32, %arg1: i32) -> (i32, i32, i32) {
    %c0_i32 = arith.constant 0 : i32
    %c0_i32_0 = arith.constant 0 : i32
    %c0_i32_1 = arith.constant 0 : i32
    %c0_i32_2 = arith.constant 0 : i32
    return %c0_i32, %c0_i32_0, %c0_i32_1 : i32, i32, i32
  }
  func.func @transform_2(%arg0: i32, %arg1: i32) -> (i32, i32) {
    %c0_i32 = arith.constant 0 : i32
    %c0_i32_0 = arith.constant 0 : i32
    %c0_i32_1 = arith.constant 0 : i32
    return %c0_i32, %c0_i32_0 : i32, i32
  }
  func.func @transform_3(%arg0: i32, %arg1: i32) -> (i32, i32, i32, i32) {
    %c0_i32 = arith.constant 0 : i32
    %c0_i32_0 = arith.constant 0 : i32
    %c0_i32_1 = arith.constant 0 : i32
    return %arg0, %arg1, %c0_i32, %c0_i32_0 : i32, i32, i32, i32
  }
}

module attributes {stable_mosaic.version = 11 : i64} {
  func.func @_fused_conv_kernel(%arg0: i32, %arg1: i32, %arg2: memref<1x4x3x3x64xbf16, #tpu.memory_space<vmem>>, %arg3: memref<16x64x128xbf16, #tpu.memory_space<vmem>>, %arg4: memref<1x128xf32, #tpu.memory_space<vmem>>, %arg5: memref<1x2x2x128xbf16, #tpu.memory_space<vmem>>) attributes {dimension_semantics = [#tpu.dimension_semantics<parallel>, #tpu.dimension_semantics<parallel>], iteration_bounds = array<i64: 2, 1>, scalar_prefetch = 0 : i64, scratch_operands = 0 : i64, tpu.core_type = #tpu.core_type<tc>, window_params = [{transform_indices = @transform_0, window_bounds = array<i64: 1, 4, 3, 3, 64>}, {pipeline_mode = #tpu.pipeline_mode<synchronous>, transform_indices = @transform_1, window_bounds = array<i64: 16, 64, 128>}, {pipeline_mode = #tpu.pipeline_mode<synchronous>, transform_indices = @transform_2, window_bounds = array<i64: 1, 128>}, {transform_indices = @transform_3, window_bounds = array<i64: 1, 2, 2, 128>}]} {
    %c0_i32 = arith.constant 0 : i32
    %c2_i32 = arith.constant 2 : i32
    %0 = arith.addi %c0_i32, %c2_i32 : i32
    %c1_i32 = arith.constant 1 : i32
    scf.for %arg6 = %c0_i32 to %0 step %c1_i32  : i32 {
      %c1_i32_1 = arith.constant 1 : i32
      %1 = arith.muli %arg6, %c1_i32_1 : i32
      %c0_i32_2 = arith.constant 0 : i32
      %2 = arith.addi %c0_i32_2, %1 : i32
      %c2_i32_3 = arith.constant 2 : i32
      %3 = arith.muli %arg1, %c2_i32_3 : i32
      %4 = arith.addi %3, %2 : i32
      %cst = arith.constant 0.000000e+00 : f32
      %5 = vector.broadcast %cst : f32 to vector<2x128xf32>
      %c0_i32_4 = arith.constant 0 : i32
      %6 = arith.addi %4, %c0_i32_4 : i32
      %c0 = arith.constant 0 : index
      %c0_5 = arith.constant 0 : index
      %7 = arith.index_cast %6 : i32 to index
      %c0_6 = arith.constant 0 : index
      %c0_7 = arith.constant 0 : index
      %8 = vector.load %arg2[%c0, %c0_5, %7, %c0_6, %c0_7] : memref<1x4x3x3x64xbf16, #tpu.memory_space<vmem>>, vector<1x1x1x2x64xbf16>
      %9 = vector.shape_cast %8 : vector<1x1x1x2x64xbf16> to vector<2x64xbf16>
      %c0_8 = arith.constant 0 : index
      %c0_9 = arith.constant 0 : index
      %c0_10 = arith.constant 0 : index
      %10 = vector.load %arg3[%c0_8, %c0_9, %c0_10] : memref<16x64x128xbf16, #tpu.memory_space<vmem>>, vector<1x64x128xbf16>
      %11 = vector.shape_cast %10 : vector<1x64x128xbf16> to vector<64x128xbf16>
      %cst_11 = arith.constant dense<0.000000e+00> : vector<2x128xf32>
      %12 = tpu.matmul %9, %11, %cst_11 {dimension_numbers = #tpu.dot_dimension_numbers<[1], [0], [0], [1], [0, 0, 1, 1], [], []>} : vector<2x64xbf16>, vector<64x128xbf16>, vector<2x128xf32> -> vector<2x128xf32>
      %13 = arith.addf %5, %12 : vector<2x128xf32>
      %c0_i32_12 = arith.constant 0 : i32
      %14 = arith.addi %4, %c0_i32_12 : i32
      %c0_13 = arith.constant 0 : index
      %c1 = arith.constant 1 : index
      %15 = arith.index_cast %14 : i32 to index
      %c0_14 = arith.constant 0 : index
      %c0_15 = arith.constant 0 : index
      %16 = vector.load %arg2[%c0_13, %c1, %15, %c0_14, %c0_15] : memref<1x4x3x3x64xbf16, #tpu.memory_space<vmem>>, vector<1x1x1x2x64xbf16>
      %17 = vector.shape_cast %16 : vector<1x1x1x2x64xbf16> to vector<2x64xbf16>
      %c1_16 = arith.constant 1 : index
      %c0_17 = arith.constant 0 : index
      %c0_18 = arith.constant 0 : index
      %18 = vector.load %arg3[%c1_16, %c0_17, %c0_18] : memref<16x64x128xbf16, #tpu.memory_space<vmem>>, vector<1x64x128xbf16>
      %19 = vector.shape_cast %18 : vector<1x64x128xbf16> to vector<64x128xbf16>
      %cst_19 = arith.constant dense<0.000000e+00> : vector<2x128xf32>
      %20 = tpu.matmul %17, %19, %cst_19 {dimension_numbers = #tpu.dot_dimension_numbers<[1], [0], [0], [1], [0, 0, 1, 1], [], []>} : vector<2x64xbf16>, vector<64x128xbf16>, vector<2x128xf32> -> vector<2x128xf32>
      %21 = arith.addf %13, %20 : vector<2x128xf32>
      %c0_i32_20 = arith.constant 0 : i32
      %22 = arith.addi %4, %c0_i32_20 : i32
      %c0_21 = arith.constant 0 : index
      %c0_22 = arith.constant 0 : index
      %23 = arith.index_cast %22 : i32 to index
      %c1_23 = arith.constant 1 : index
      %c0_24 = arith.constant 0 : index
      %24 = vector.load %arg2[%c0_21, %c0_22, %23, %c1_23, %c0_24] : memref<1x4x3x3x64xbf16, #tpu.memory_space<vmem>>, vector<1x1x1x2x64xbf16>
      %25 = vector.shape_cast %24 : vector<1x1x1x2x64xbf16> to vector<2x64xbf16>
      %c2 = arith.constant 2 : index
      %c0_25 = arith.constant 0 : index
      %c0_26 = arith.constant 0 : index
      %26 = vector.load %arg3[%c2, %c0_25, %c0_26] : memref<16x64x128xbf16, #tpu.memory_space<vmem>>, vector<1x64x128xbf16>
      %27 = vector.shape_cast %26 : vector<1x64x128xbf16> to vector<64x128xbf16>
      %cst_27 = arith.constant dense<0.000000e+00> : vector<2x128xf32>
      %28 = tpu.matmul %25, %27, %cst_27 {dimension_numbers = #tpu.dot_dimension_numbers<[1], [0], [0], [1], [0, 0, 1, 1], [], []>} : vector<2x64xbf16>, vector<64x128xbf16>, vector<2x128xf32> -> vector<2x128xf32>
      %29 = arith.addf %21, %28 : vector<2x128xf32>
      %c0_i32_28 = arith.constant 0 : i32
      %30 = arith.addi %4, %c0_i32_28 : i32
      %c0_29 = arith.constant 0 : index
      %c1_30 = arith.constant 1 : index
      %31 = arith.index_cast %30 : i32 to index
      %c1_31 = arith.constant 1 : index
      %c0_32 = arith.constant 0 : index
      %32 = vector.load %arg2[%c0_29, %c1_30, %31, %c1_31, %c0_32] : memref<1x4x3x3x64xbf16, #tpu.memory_space<vmem>>, vector<1x1x1x2x64xbf16>
      %33 = vector.shape_cast %32 : vector<1x1x1x2x64xbf16> to vector<2x64xbf16>
      %c3 = arith.constant 3 : index
      %c0_33 = arith.constant 0 : index
      %c0_34 = arith.constant 0 : index
      %34 = vector.load %arg3[%c3, %c0_33, %c0_34] : memref<16x64x128xbf16, #tpu.memory_space<vmem>>, vector<1x64x128xbf16>
      %35 = vector.shape_cast %34 : vector<1x64x128xbf16> to vector<64x128xbf16>
      %cst_35 = arith.constant dense<0.000000e+00> : vector<2x128xf32>
      %36 = tpu.matmul %33, %35, %cst_35 {dimension_numbers = #tpu.dot_dimension_numbers<[1], [0], [0], [1], [0, 0, 1, 1], [], []>} : vector<2x64xbf16>, vector<64x128xbf16>, vector<2x128xf32> -> vector<2x128xf32>
      %37 = arith.addf %29, %36 : vector<2x128xf32>
      %c0_i32_36 = arith.constant 0 : i32
      %38 = arith.addi %4, %c0_i32_36 : i32
      %c0_37 = arith.constant 0 : index
      %c2_38 = arith.constant 2 : index
      %39 = arith.index_cast %38 : i32 to index
      %c0_39 = arith.constant 0 : index
      %c0_40 = arith.constant 0 : index
      %40 = vector.load %arg2[%c0_37, %c2_38, %39, %c0_39, %c0_40] : memref<1x4x3x3x64xbf16, #tpu.memory_space<vmem>>, vector<1x1x1x2x64xbf16>
      %41 = vector.shape_cast %40 : vector<1x1x1x2x64xbf16> to vector<2x64xbf16>
      %c4 = arith.constant 4 : index
      %c0_41 = arith.constant 0 : index
      %c0_42 = arith.constant 0 : index
      %42 = vector.load %arg3[%c4, %c0_41, %c0_42] : memref<16x64x128xbf16, #tpu.memory_space<vmem>>, vector<1x64x128xbf16>
      %43 = vector.shape_cast %42 : vector<1x64x128xbf16> to vector<64x128xbf16>
      %cst_43 = arith.constant dense<0.000000e+00> : vector<2x128xf32>
      %44 = tpu.matmul %41, %43, %cst_43 {dimension_numbers = #tpu.dot_dimension_numbers<[1], [0], [0], [1], [0, 0, 1, 1], [], []>} : vector<2x64xbf16>, vector<64x128xbf16>, vector<2x128xf32> -> vector<2x128xf32>
      %45 = arith.addf %37, %44 : vector<2x128xf32>
      %c0_i32_44 = arith.constant 0 : i32
      %46 = arith.addi %4, %c0_i32_44 : i32
      %c0_45 = arith.constant 0 : index
      %c3_46 = arith.constant 3 : index
      %47 = arith.index_cast %46 : i32 to index
      %c0_47 = arith.constant 0 : index
      %c0_48 = arith.constant 0 : index
      %48 = vector.load %arg2[%c0_45, %c3_46, %47, %c0_47, %c0_48] : memref<1x4x3x3x64xbf16, #tpu.memory_space<vmem>>, vector<1x1x1x2x64xbf16>
      %49 = vector.shape_cast %48 : vector<1x1x1x2x64xbf16> to vector<2x64xbf16>
      %c5 = arith.constant 5 : index
      %c0_49 = arith.constant 0 : index
      %c0_50 = arith.constant 0 : index
      %50 = vector.load %arg3[%c5, %c0_49, %c0_50] : memref<16x64x128xbf16, #tpu.memory_space<vmem>>, vector<1x64x128xbf16>
      %51 = vector.shape_cast %50 : vector<1x64x128xbf16> to vector<64x128xbf16>
      %cst_51 = arith.constant dense<0.000000e+00> : vector<2x128xf32>
      %52 = tpu.matmul %49, %51, %cst_51 {dimension_numbers = #tpu.dot_dimension_numbers<[1], [0], [0], [1], [0, 0, 1, 1], [], []>} : vector<2x64xbf16>, vector<64x128xbf16>, vector<2x128xf32> -> vector<2x128xf32>
      %53 = arith.addf %45, %52 : vector<2x128xf32>
      %c0_i32_52 = arith.constant 0 : i32
      %54 = arith.addi %4, %c0_i32_52 : i32
      %c0_53 = arith.constant 0 : index
      %c2_54 = arith.constant 2 : index
      %55 = arith.index_cast %54 : i32 to index
      %c1_55 = arith.constant 1 : index
      %c0_56 = arith.constant 0 : index
      %56 = vector.load %arg2[%c0_53, %c2_54, %55, %c1_55, %c0_56] : memref<1x4x3x3x64xbf16, #tpu.memory_space<vmem>>, vector<1x1x1x2x64xbf16>
      %57 = vector.shape_cast %56 : vector<1x1x1x2x64xbf16> to vector<2x64xbf16>
      %c6 = arith.constant 6 : index
      %c0_57 = arith.constant 0 : index
      %c0_58 = arith.constant 0 : index
      %58 = vector.load %arg3[%c6, %c0_57, %c0_58] : memref<16x64x128xbf16, #tpu.memory_space<vmem>>, vector<1x64x128xbf16>
      %59 = vector.shape_cast %58 : vector<1x64x128xbf16> to vector<64x128xbf16>
      %cst_59 = arith.constant dense<0.000000e+00> : vector<2x128xf32>
      %60 = tpu.matmul %57, %59, %cst_59 {dimension_numbers = #tpu.dot_dimension_numbers<[1], [0], [0], [1], [0, 0, 1, 1], [], []>} : vector<2x64xbf16>, vector<64x128xbf16>, vector<2x128xf32> -> vector<2x128xf32>
      %61 = arith.addf %53, %60 : vector<2x128xf32>
      %c0_i32_60 = arith.constant 0 : i32
      %62 = arith.addi %4, %c0_i32_60 : i32
      %c0_61 = arith.constant 0 : index
      %c3_62 = arith.constant 3 : index
      %63 = arith.index_cast %62 : i32 to index
      %c1_63 = arith.constant 1 : index
      %c0_64 = arith.constant 0 : index
      %64 = vector.load %arg2[%c0_61, %c3_62, %63, %c1_63, %c0_64] : memref<1x4x3x3x64xbf16, #tpu.memory_space<vmem>>, vector<1x1x1x2x64xbf16>
      %65 = vector.shape_cast %64 : vector<1x1x1x2x64xbf16> to vector<2x64xbf16>
      %c7 = arith.constant 7 : index
      %c0_65 = arith.constant 0 : index
      %c0_66 = arith.constant 0 : index
      %66 = vector.load %arg3[%c7, %c0_65, %c0_66] : memref<16x64x128xbf16, #tpu.memory_space<vmem>>, vector<1x64x128xbf16>
      %67 = vector.shape_cast %66 : vector<1x64x128xbf16> to vector<64x128xbf16>
      %cst_67 = arith.constant dense<0.000000e+00> : vector<2x128xf32>
      %68 = tpu.matmul %65, %67, %cst_67 {dimension_numbers = #tpu.dot_dimension_numbers<[1], [0], [0], [1], [0, 0, 1, 1], [], []>} : vector<2x64xbf16>, vector<64x128xbf16>, vector<2x128xf32> -> vector<2x128xf32>
      %69 = arith.addf %61, %68 : vector<2x128xf32>
      %c1_i32_68 = arith.constant 1 : i32
      %70 = arith.addi %4, %c1_i32_68 : i32
      %c0_69 = arith.constant 0 : index
      %c0_70 = arith.constant 0 : index
      %71 = arith.index_cast %70 : i32 to index
      %c0_71 = arith.constant 0 : index
      %c0_72 = arith.constant 0 : index
      %72 = vector.load %arg2[%c0_69, %c0_70, %71, %c0_71, %c0_72] : memref<1x4x3x3x64xbf16, #tpu.memory_space<vmem>>, vector<1x1x1x2x64xbf16>
      %73 = vector.shape_cast %72 : vector<1x1x1x2x64xbf16> to vector<2x64xbf16>
      %c8 = arith.constant 8 : index
      %c0_73 = arith.constant 0 : index
      %c0_74 = arith.constant 0 : index
      %74 = vector.load %arg3[%c8, %c0_73, %c0_74] : memref<16x64x128xbf16, #tpu.memory_space<vmem>>, vector<1x64x128xbf16>
      %75 = vector.shape_cast %74 : vector<1x64x128xbf16> to vector<64x128xbf16>
      %cst_75 = arith.constant dense<0.000000e+00> : vector<2x128xf32>
      %76 = tpu.matmul %73, %75, %cst_75 {dimension_numbers = #tpu.dot_dimension_numbers<[1], [0], [0], [1], [0, 0, 1, 1], [], []>} : vector<2x64xbf16>, vector<64x128xbf16>, vector<2x128xf32> -> vector<2x128xf32>
      %77 = arith.addf %69, %76 : vector<2x128xf32>
      %c1_i32_76 = arith.constant 1 : i32
      %78 = arith.addi %4, %c1_i32_76 : i32
      %c0_77 = arith.constant 0 : index
      %c1_78 = arith.constant 1 : index
      %79 = arith.index_cast %78 : i32 to index
      %c0_79 = arith.constant 0 : index
      %c0_80 = arith.constant 0 : index
      %80 = vector.load %arg2[%c0_77, %c1_78, %79, %c0_79, %c0_80] : memref<1x4x3x3x64xbf16, #tpu.memory_space<vmem>>, vector<1x1x1x2x64xbf16>
      %81 = vector.shape_cast %80 : vector<1x1x1x2x64xbf16> to vector<2x64xbf16>
      %c9 = arith.constant 9 : index
      %c0_81 = arith.constant 0 : index
      %c0_82 = arith.constant 0 : index
      %82 = vector.load %arg3[%c9, %c0_81, %c0_82] : memref<16x64x128xbf16, #tpu.memory_space<vmem>>, vector<1x64x128xbf16>
      %83 = vector.shape_cast %82 : vector<1x64x128xbf16> to vector<64x128xbf16>
      %cst_83 = arith.constant dense<0.000000e+00> : vector<2x128xf32>
      %84 = tpu.matmul %81, %83, %cst_83 {dimension_numbers = #tpu.dot_dimension_numbers<[1], [0], [0], [1], [0, 0, 1, 1], [], []>} : vector<2x64xbf16>, vector<64x128xbf16>, vector<2x128xf32> -> vector<2x128xf32>
      %85 = arith.addf %77, %84 : vector<2x128xf32>
      %c1_i32_84 = arith.constant 1 : i32
      %86 = arith.addi %4, %c1_i32_84 : i32
      %c0_85 = arith.constant 0 : index
      %c0_86 = arith.constant 0 : index
      %87 = arith.index_cast %86 : i32 to index
      %c1_87 = arith.constant 1 : index
      %c0_88 = arith.constant 0 : index
      %88 = vector.load %arg2[%c0_85, %c0_86, %87, %c1_87, %c0_88] : memref<1x4x3x3x64xbf16, #tpu.memory_space<vmem>>, vector<1x1x1x2x64xbf16>
      %89 = vector.shape_cast %88 : vector<1x1x1x2x64xbf16> to vector<2x64xbf16>
      %c10 = arith.constant 10 : index
      %c0_89 = arith.constant 0 : index
      %c0_90 = arith.constant 0 : index
      %90 = vector.load %arg3[%c10, %c0_89, %c0_90] : memref<16x64x128xbf16, #tpu.memory_space<vmem>>, vector<1x64x128xbf16>
      %91 = vector.shape_cast %90 : vector<1x64x128xbf16> to vector<64x128xbf16>
      %cst_91 = arith.constant dense<0.000000e+00> : vector<2x128xf32>
      %92 = tpu.matmul %89, %91, %cst_91 {dimension_numbers = #tpu.dot_dimension_numbers<[1], [0], [0], [1], [0, 0, 1, 1], [], []>} : vector<2x64xbf16>, vector<64x128xbf16>, vector<2x128xf32> -> vector<2x128xf32>
      %93 = arith.addf %85, %92 : vector<2x128xf32>
      %c1_i32_92 = arith.constant 1 : i32
      %94 = arith.addi %4, %c1_i32_92 : i32
      %c0_93 = arith.constant 0 : index
      %c1_94 = arith.constant 1 : index
      %95 = arith.index_cast %94 : i32 to index
      %c1_95 = arith.constant 1 : index
      %c0_96 = arith.constant 0 : index
      %96 = vector.load %arg2[%c0_93, %c1_94, %95, %c1_95, %c0_96] : memref<1x4x3x3x64xbf16, #tpu.memory_space<vmem>>, vector<1x1x1x2x64xbf16>
      %97 = vector.shape_cast %96 : vector<1x1x1x2x64xbf16> to vector<2x64xbf16>
      %c11 = arith.constant 11 : index
      %c0_97 = arith.constant 0 : index
      %c0_98 = arith.constant 0 : index
      %98 = vector.load %arg3[%c11, %c0_97, %c0_98] : memref<16x64x128xbf16, #tpu.memory_space<vmem>>, vector<1x64x128xbf16>
      %99 = vector.shape_cast %98 : vector<1x64x128xbf16> to vector<64x128xbf16>
      %cst_99 = arith.constant dense<0.000000e+00> : vector<2x128xf32>
      %100 = tpu.matmul %97, %99, %cst_99 {dimension_numbers = #tpu.dot_dimension_numbers<[1], [0], [0], [1], [0, 0, 1, 1], [], []>} : vector<2x64xbf16>, vector<64x128xbf16>, vector<2x128xf32> -> vector<2x128xf32>
      %101 = arith.addf %93, %100 : vector<2x128xf32>
      %c1_i32_100 = arith.constant 1 : i32
      %102 = arith.addi %4, %c1_i32_100 : i32
      %c0_101 = arith.constant 0 : index
      %c2_102 = arith.constant 2 : index
      %103 = arith.index_cast %102 : i32 to index
      %c0_103 = arith.constant 0 : index
      %c0_104 = arith.constant 0 : index
      %104 = vector.load %arg2[%c0_101, %c2_102, %103, %c0_103, %c0_104] : memref<1x4x3x3x64xbf16, #tpu.memory_space<vmem>>, vector<1x1x1x2x64xbf16>
      %105 = vector.shape_cast %104 : vector<1x1x1x2x64xbf16> to vector<2x64xbf16>
      %c12 = arith.constant 12 : index
      %c0_105 = arith.constant 0 : index
      %c0_106 = arith.constant 0 : index
      %106 = vector.load %arg3[%c12, %c0_105, %c0_106] : memref<16x64x128xbf16, #tpu.memory_space<vmem>>, vector<1x64x128xbf16>
      %107 = vector.shape_cast %106 : vector<1x64x128xbf16> to vector<64x128xbf16>
      %cst_107 = arith.constant dense<0.000000e+00> : vector<2x128xf32>
      %108 = tpu.matmul %105, %107, %cst_107 {dimension_numbers = #tpu.dot_dimension_numbers<[1], [0], [0], [1], [0, 0, 1, 1], [], []>} : vector<2x64xbf16>, vector<64x128xbf16>, vector<2x128xf32> -> vector<2x128xf32>
      %109 = arith.addf %101, %108 : vector<2x128xf32>
      %c1_i32_108 = arith.constant 1 : i32
      %110 = arith.addi %4, %c1_i32_108 : i32
      %c0_109 = arith.constant 0 : index
      %c3_110 = arith.constant 3 : index
      %111 = arith.index_cast %110 : i32 to index
      %c0_111 = arith.constant 0 : index
      %c0_112 = arith.constant 0 : index
      %112 = vector.load %arg2[%c0_109, %c3_110, %111, %c0_111, %c0_112] : memref<1x4x3x3x64xbf16, #tpu.memory_space<vmem>>, vector<1x1x1x2x64xbf16>
      %113 = vector.shape_cast %112 : vector<1x1x1x2x64xbf16> to vector<2x64xbf16>
      %c13 = arith.constant 13 : index
      %c0_113 = arith.constant 0 : index
      %c0_114 = arith.constant 0 : index
      %114 = vector.load %arg3[%c13, %c0_113, %c0_114] : memref<16x64x128xbf16, #tpu.memory_space<vmem>>, vector<1x64x128xbf16>
      %115 = vector.shape_cast %114 : vector<1x64x128xbf16> to vector<64x128xbf16>
      %cst_115 = arith.constant dense<0.000000e+00> : vector<2x128xf32>
      %116 = tpu.matmul %113, %115, %cst_115 {dimension_numbers = #tpu.dot_dimension_numbers<[1], [0], [0], [1], [0, 0, 1, 1], [], []>} : vector<2x64xbf16>, vector<64x128xbf16>, vector<2x128xf32> -> vector<2x128xf32>
      %117 = arith.addf %109, %116 : vector<2x128xf32>
      %c1_i32_116 = arith.constant 1 : i32
      %118 = arith.addi %4, %c1_i32_116 : i32
      %c0_117 = arith.constant 0 : index
      %c2_118 = arith.constant 2 : index
      %119 = arith.index_cast %118 : i32 to index
      %c1_119 = arith.constant 1 : index
      %c0_120 = arith.constant 0 : index
      %120 = vector.load %arg2[%c0_117, %c2_118, %119, %c1_119, %c0_120] : memref<1x4x3x3x64xbf16, #tpu.memory_space<vmem>>, vector<1x1x1x2x64xbf16>
      %121 = vector.shape_cast %120 : vector<1x1x1x2x64xbf16> to vector<2x64xbf16>
      %c14 = arith.constant 14 : index
      %c0_121 = arith.constant 0 : index
      %c0_122 = arith.constant 0 : index
      %122 = vector.load %arg3[%c14, %c0_121, %c0_122] : memref<16x64x128xbf16, #tpu.memory_space<vmem>>, vector<1x64x128xbf16>
      %123 = vector.shape_cast %122 : vector<1x64x128xbf16> to vector<64x128xbf16>
      %cst_123 = arith.constant dense<0.000000e+00> : vector<2x128xf32>
      %124 = tpu.matmul %121, %123, %cst_123 {dimension_numbers = #tpu.dot_dimension_numbers<[1], [0], [0], [1], [0, 0, 1, 1], [], []>} : vector<2x64xbf16>, vector<64x128xbf16>, vector<2x128xf32> -> vector<2x128xf32>
      %125 = arith.addf %117, %124 : vector<2x128xf32>
      %c1_i32_124 = arith.constant 1 : i32
      %126 = arith.addi %4, %c1_i32_124 : i32
      %c0_125 = arith.constant 0 : index
      %c3_126 = arith.constant 3 : index
      %127 = arith.index_cast %126 : i32 to index
      %c1_127 = arith.constant 1 : index
      %c0_128 = arith.constant 0 : index
      %128 = vector.load %arg2[%c0_125, %c3_126, %127, %c1_127, %c0_128] : memref<1x4x3x3x64xbf16, #tpu.memory_space<vmem>>, vector<1x1x1x2x64xbf16>
      %129 = vector.shape_cast %128 : vector<1x1x1x2x64xbf16> to vector<2x64xbf16>
      %c15 = arith.constant 15 : index
      %c0_129 = arith.constant 0 : index
      %c0_130 = arith.constant 0 : index
      %130 = vector.load %arg3[%c15, %c0_129, %c0_130] : memref<16x64x128xbf16, #tpu.memory_space<vmem>>, vector<1x64x128xbf16>
      %131 = vector.shape_cast %130 : vector<1x64x128xbf16> to vector<64x128xbf16>
      %cst_131 = arith.constant dense<0.000000e+00> : vector<2x128xf32>
      %132 = tpu.matmul %129, %131, %cst_131 {dimension_numbers = #tpu.dot_dimension_numbers<[1], [0], [0], [1], [0, 0, 1, 1], [], []>} : vector<2x64xbf16>, vector<64x128xbf16>, vector<2x128xf32> -> vector<2x128xf32>
      %133 = arith.addf %125, %132 : vector<2x128xf32>
      %c0_132 = arith.constant 0 : index
      %c0_133 = arith.constant 0 : index
      %134 = vector.load %arg4[%c0_132, %c0_133] : memref<1x128xf32, #tpu.memory_space<vmem>>, vector<1x128xf32>
      %135 = vector.broadcast %134 : vector<1x128xf32> to vector<2x128xf32>
      %136 = arith.addf %133, %135 : vector<2x128xf32>
      %cst_134 = arith.constant 0.000000e+00 : f32
      %137 = vector.broadcast %cst_134 : f32 to vector<2x128xf32>
      %138 = arith.cmpf oge, %136, %137 : vector<2x128xf32>
      %cst_135 = arith.constant 2.000000e-01 : f32
      %139 = vector.broadcast %cst_135 : f32 to vector<2x128xf32>
      %140 = arith.mulf %136, %139 : vector<2x128xf32>
      %141 = arith.select %138, %136, %140 : vector<2x128xi1>, vector<2x128xf32>
      %142 = arith.truncf %141 : vector<2x128xf32> to vector<2x128xbf16>
      %c0_136 = arith.constant 0 : index
      %143 = arith.index_cast %2 : i32 to index
      %c0_137 = arith.constant 0 : index
      %c0_138 = arith.constant 0 : index
      %144 = vector.load %arg5[%c0_136, %143, %c0_137, %c0_138] : memref<1x2x2x128xbf16, #tpu.memory_space<vmem>>, vector<1x1x2x128xbf16>
      %145 = vector.shape_cast %144 : vector<1x1x2x128xbf16> to vector<2x128xbf16>
      %146 = vector.shape_cast %142 : vector<2x128xbf16> to vector<1x1x2x128xbf16>
      tpu.vector_store %arg5[%c0_136, %143, %c0_137, %c0_138], %146 {strides = array<i32>} : memref<1x2x2x128xbf16, #tpu.memory_space<vmem>>, vector<1x1x2x128xbf16>,
    }
    %c2_i32_0 = arith.constant 2 : i32
    return
  }
  func.func @transform_0(%arg0: i32, %arg1: i32) -> (i32, i32, i32, i32, i32) {
    %c0_i32 = arith.constant 0 : i32
    %c0_i32_0 = arith.constant 0 : i32
    %c0_i32_1 = arith.constant 0 : i32
    %c0_i32_2 = arith.constant 0 : i32
    %c0_i32_3 = arith.constant 0 : i32
    return %arg0, %c0_i32, %c0_i32_0, %c0_i32_1, %c0_i32_2 : i32, i32, i32, i32, i32
  }
  func.func @transform_1(%arg0: i32, %arg1: i32) -> (i32, i32, i32) {
    %c0_i32 = arith.constant 0 : i32
    %c0_i32_0 = arith.constant 0 : i32
    %c0_i32_1 = arith.constant 0 : i32
    %c0_i32_2 = arith.constant 0 : i32
    return %c0_i32, %c0_i32_0, %c0_i32_1 : i32, i32, i32
  }
  func.func @transform_2(%arg0: i32, %arg1: i32) -> (i32, i32) {
    %c0_i32 = arith.constant 0 : i32
    %c0_i32_0 = arith.constant 0 : i32
    %c0_i32_1 = arith.constant 0 : i32
    return %c0_i32, %c0_i32_0 : i32, i32
  }
  func.func @transform_3(%arg0: i32, %arg1: i32) -> (i32, i32, i32, i32) {
    %c0_i32 = arith.constant 0 : i32
    %c0_i32_0 = arith.constant 0 : i32
    %c0_i32_1 = arith.constant 0 : i32
    return %arg0, %arg1, %c0_i32, %c0_i32_0 : i32, i32, i32, i32
  }
}

</mosaic_0001>

<bundles_post_ra>
// kernel: fdiscriminator_forward.3
= control target key start
LH: loop header
LB: loop body
LE: loop exit
PB: predicated region body
PF: predicated region fallthrough
CT: control target
= control target key end

     0   :  { %s1215_s12 = smov 0   ;;  %s1217_s13 = smov 0   ;;  %s1357_s0 = inlined_call_operand.vmem [shape: bf16[2,4,9,9,16], index: 0, kind: input, shape index: {}]   ;;  %s1358_s1 = inlined_call_operand.vmem [shape: bf16[16,16,32], index: 1, kind: input, shape index: {}]   ;;  %s1359_s2 = inlined_call_operand.vmem [shape: f32[1,32], index: 2, kind: input, shape index: {}]   ;;  %s1360_s3 = inlined_call_operand.vmem [shape: bf16[2,8,8,32], index: 3, kind: output, shape index: {}]  }
   0x1   :  { %s1219_s14 = smov 0  }
   0x2 LB: > { %s25_s15 = sadd.s32 1, %s1185_s13  ;;  %p912_p0 = scmp.ge.s32.totalorder %s1189_s14, 1  ;;  %s1189_s14 = sphi %s1219_s14, %s13_s14   ;;  %s1185_s13 = sphi %s1217_s13, %s1362_s13   ;;  %s1181_s12 = sphi %s1215_s12, %s1361_s12  }
   0x3   : > { %p27_p1 = scmp.ge.s32.totalorder %s25_s15, 2  ;;  %p151_p2 = scmp.lt.s32.totalorder %s1189_s14, 3 }
   0x5   : > { %s1364_s15 = smov (%p27_p1, %s25_s15), 0  ;;  %p152_p3 = pnand %p912_p0, %p151_p2 }
   0x6   : > { %p179_p4 = scmp.lt.s32.totalorder (!%p152_p3), %s1181_s12, 1  ;;  %s1243_s24 = smov (!%p152_p3), 0  }
   0x7   : > { %155 = sbr.rel (%p152_p3) target bundleno = 221 (0xdd), region = 32 }
   0xc   : > { %s1366_s12 = smov (!%p179_p4, %s1181_s12), 1 }
   0xd   : > { %s1129_s16 = smul.u32 288, %s1366_s12  ;;  %s1097_s17 = sshll.u32 %s1366_s12, 5 }
   0xe   : > { %s1236_s20 = scalar_lea.vmem %s1360_s3, %s1097_s17 }
   0xf   : > { %s1241_s23 = scalar_lea.vmem %s1357_s0, %s1129_s16 }
  0x10 LB: >> { %v1101_v0 = vld [vmem:[%s1358_s1 + $0x8] sm:$0xff]  ;;  %v1099_v1 = vld [vmem:[%s1358_s1] sm:$0xff]  ;;  %v1103_v2 = vld [vmem:[%s1358_s1 + $0x10] sm:$0xff]  ;;  %s1098_s10 = sshll.u32 %s1193_s24, 3  ;;  %vm222_vm0 = vcmask 130048   ;;  %s1094_s16 = sshll.u32 %s1193_s24, 2  ;;  %s1193_s24 = sphi %s1243_s24, %s200_s24  }
  0x11   : >> { %v1105_v3 = vld [vmem:[%s1358_s1 + $0x18] sm:$0xff]  ;;  %v1111_v4 = vld [vmem:[%s1358_s1 + $0x30] sm:$0xff]  ;;  %v1107_v5 = vld [vmem:[%s1358_s1 + $0x20] sm:$0xff]  ;;  %233 = vmatpush.bf16.msra.mxu0 %v1101_v0  ;;  %255 = vmatpush.bf16.msra.mxu1 %v1099_v1  ;;  %s1274_s18 = scalar_lea.vmem %s1241_s23, %s1098_s10  ;;  %s772_s17 = scalar_lea.vmem %s1236_s20, %s1094_s16  ;;  %vm773_vm2 = vcmask 257024  }
  0x12   : >> { %v1113_v6 = vld [vmem:[%s1358_s1 + $0x38] sm:$0xff]  ;;  %v1109_v7 = vld [vmem:[%s1358_s1 + $0x28] sm:$0xff]  ;;  %294 = vmatpush.bf16.msra.mxu2 %v1103_v2  ;;  %334 = vmatpush.bf16.msra.mxu3 %v1105_v3  ;;  %v1114_v8 = vld [vmem:[%s1358_s1 + $0x40] sm:$0xff]  ;;  %s200_s24 = sadd.s32 1, %s1193_s24  }
  0x13   : >> { %v1116_v9 = vld [vmem:[%s1358_s1 + $0x48] sm:$0xff]  ;;  %v206_v11 = vld [vmem:[%s1274_s18] sm:$0xf]  ;;  %v1102_v13 = vld [vmem:[%s1274_s18] sm:$0x10]  ;;  %p197_p5 = scmp.ge.s32.totalorder %s200_s24, 8  }
  0x14   : >> { %v920_v10 = vld [vmem:[%s1274_s18 + $0x48] sm:$0xf]  ;;  %v937_v12 = vld [vmem:[%s1274_s18] sm:$0xf]  ;;  %932 = vmatmul.msk.bf16.vlgmr.msra.gmra.mxu1 %vm222_vm0, %v206_v11  ;;  %v1104_v15 = vld [vmem:[%s1274_s18 + $0x48] sm:$0x10] }
  0x15   : >> { %364 = vmatpush.bf16.msrb.mxu0 %v1107_v5  ;;  %v950_v14 = vld [vmem:[%s1274_s18 + $0x48] sm:$0xf]  ;;  %v938_v16 = vor.u32 %v1102_v13, %v937_v12  ;;  %394 = vmatpush.bf16.msrb.mxu1 %v1109_v7  ;;  %v1118_v22 = vld [vmem:[%s1358_s1 + $0x50] sm:$0xff]  ;;  %v1120_v23 = vld [vmem:[%s1358_s1 + $0x58] sm:$0xff] }
  0x16   : >> { %434 = vmatpush.bf16.msrb.mxu2 %v1111_v4  ;;  %927 = vmatmul.msk.bf16.vlgmr.msra.gmra.mxu0 %vm222_vm0, %v920_v10  ;;  %v951_v17 = vor.u32 %v1104_v15, %v950_v14  ;;  %v983_v26 = vld [vmem:[%s1274_s18 + $0x90] sm:$0xf]  ;;  %v1110_v27 = vld [vmem:[%s1274_s18 + $0x90] sm:$0x10]  ;;  %v996_v28 = vld [vmem:[%s1274_s18 + $0xd8] sm:$0xf] }
  0x17   : >> { %474 = vmatpush.bf16.msrb.mxu3 %v1113_v6  ;;  %v272_v18 = vshrl.u32 %v938_v16, 16  ;;  %v274_v19 = vshll.u32 %v938_v16, 16  ;;  %v1112_v29 = vld [vmem:[%s1274_s18 + $0xd8] sm:$0x10]  ;;  %v984_v32 = vor.u32 %v1110_v27, %v983_v26  ;;  %v959_v34 = vld [vmem:[%s1274_s18 + $0x90] sm:$0xf] }
  0x18   : >> { %v312_v20 = vshrl.u32 %v951_v17, 16  ;;  %v314_v21 = vshll.u32 %v951_v17, 16  ;;  %v997_v33 = vor.u32 %v1112_v29, %v996_v28  ;;  %v969_v35 = vld [vmem:[%s1274_s18 + $0xd8] sm:$0xf]  ;;  %v1122_v38 = vld [vmem:[%s1358_s1 + $0x60] sm:$0xff]  ;;  %v1124_v39 = vld [vmem:[%s1358_s1 + $0x68] sm:$0xff] }
  0x19   : >> { %505 = vmatpush.bf16.msra.mxu0 %v1114_v8  ;;  %535 = vmatpush.bf16.msra.mxu1 %v1116_v9  ;;  %v276_v24 = vrot.slane %v274_v19, 1  ;;  %v414_v36 = vshll.u32 %v984_v32, 16  ;;  %v412_v40 = vshrl.u32 %v984_v32, 16  ;;  %v1028_v46 = vld [vmem:[%s1274_s18 + $0x8] sm:$0xf]  ;;  %v1126_v50 = vld [vmem:[%s1358_s1 + $0x70] sm:$0xff] }
  0x1a   : >> { %v316_v25 = vrot.slane %v314_v21, 1  ;;  %v454_v37 = vshll.u32 %v997_v33, 16  ;;  %v452_v42 = vshrl.u32 %v997_v33, 16  ;;  %v1117_v47 = vld [vmem:[%s1274_s18 + $0x8] sm:$0x10]  ;;  %v1128_v51 = vld [vmem:[%s1358_s1 + $0x78] sm:$0xff] }
  0x1b   : >> { %v277_v30 = vor.u32 %v276_v24, %v272_v18  ;;  %v416_v41 = vrot.slane %v414_v36, 1  ;;  %v1041_v48 = vld [vmem:[%s1274_s18 + $0x50] sm:$0xf]  ;;  %v1119_v49 = vld [vmem:[%s1274_s18 + $0x50] sm:$0x10]  ;;  %v1029_v52 = vor.u32 %v1117_v47, %v1028_v46 }
  0x1c   : >> { %v317_v31 = vor.u32 %v316_v25, %v312_v20  ;;  %v456_v43 = vrot.slane %v454_v37, 1  ;;  %v1042_v53 = vor.u32 %v1119_v49, %v1041_v48  ;;  %v1004_v54 = vld [vmem:[%s1274_s18 + $0x8] sm:$0xf]  ;;  %v1014_v55 = vld [vmem:[%s1274_s18 + $0x50] sm:$0xf] }
  0x1d   : >> { %943 = vmatmul.msk.bf16.vlgmr.msra.gmra.mxu2 %vm222_vm0, %v277_v30  ;;  %v417_v44 = vor.u32 %v416_v41, %v412_v40  ;;  %v555_v56 = vshll.u32 %v1029_v52, 16  ;;  %v553_v58 = vshrl.u32 %v1029_v52, 16  ;;  %v1074_v0 = vld [vmem:[%s1274_s18 + $0x98] sm:$0xf]  ;;  %v1125_v1 = vld [vmem:[%s1274_s18 + $0x98] sm:$0x10] }
  0x1e   : >> { %956 = vmatmul.msk.bf16.vlgmr.msra.gmra.mxu3 %vm222_vm0, %v317_v31  ;;  %575 = vmatpush.bf16.msra.mxu2 %v1118_v22  ;;  %v457_v45 = vor.u32 %v456_v43, %v452_v42  ;;  %v595_v57 = vshll.u32 %v1042_v53, 16  ;;  %v593_v60 = vshrl.u32 %v1042_v53, 16  ;;  %v1087_v2 = vld [vmem:[%s1274_s18 + $0xe0] sm:$0xf]  ;;  %v1127_v3 = vld [vmem:[%s1274_s18 + $0xe0] sm:$0x10]  ;;  %v1075_v4 = vor.u32 %v1125_v1, %v1074_v0 }
  0x1f   : >> { %615 = vmatpush.bf16.msra.mxu3 %v1120_v23  ;;  %v557_v59 = vrot.slane %v555_v56, 1  ;;  %v1088_v5 = vor.u32 %v1127_v3, %v1087_v2  ;;  %v1050_v6 = vld [vmem:[%s1274_s18 + $0x98] sm:$0xf]  ;;  %v1060_v7 = vld [vmem:[%s1274_s18 + $0xe0] sm:$0xf] }
  0x20   : >> { %v597_v61 = vrot.slane %v595_v57, 1  ;;  %v695_v8 = vshll.u32 %v1075_v4, 16  ;;  %v693_v10 = vshrl.u32 %v1075_v4, 16 }
  0x21   : >> { %v558_v62 = vor.u32 %v557_v59, %v553_v58  ;;  %v735_v9 = vshll.u32 %v1088_v5, 16  ;;  %v733_v12 = vshrl.u32 %v1088_v5, 16 }
  0x22   : >> { %v598_v63 = vor.u32 %v597_v61, %v593_v60  ;;  %v697_v11 = vrot.slane %v695_v8, 1  ;;  %v1162_v60 = vld [vmem:[%s1359_s2] ss:$0 sm:$0xff] }
  0x23   : >> { %v737_v13 = vrot.slane %v735_v9, 1 }
  0x24   : >> { %976 = vmatmul.msk.bf16.vlgmr.msrb.gmra.mxu1 %vm222_vm0, %v969_v35  ;;  %v698_v14 = vor.u32 %v697_v11, %v693_v10 }
  0x25   : >> { %675 = vmatpush.bf16.msrb.mxu1 %v1124_v39  ;;  %v738_v15 = vor.u32 %v737_v13, %v733_v12 }
  0x26   : >> { %966 = vmatmul.msk.bf16.vlgmr.msrb.gmra.mxu0 %vm222_vm0, %v959_v34 }
  0x27   : >> { %645 = vmatpush.bf16.msrb.mxu0 %v1122_v38 }
  0x2d   : >> { %989 = vmatmul.msk.bf16.vlgmr.msrb.gmra.mxu2 %vm222_vm0, %v417_v44 }
  0x2e   : >> { %1002 = vmatmul.msk.bf16.vlgmr.msrb.gmra.mxu3 %vm222_vm0, %v457_v45  ;;  %715 = vmatpush.bf16.msrb.mxu2 %v1126_v50 }
  0x2f   : >> { %755 = vmatpush.bf16.msrb.mxu3 %v1128_v51 }
  0x34   : >> { %1021 = vmatmul.msk.bf16.vlgmr.msra.gmra.mxu1 %vm222_vm0, %v1014_v55 }
  0x36   : >> { %1011 = vmatmul.msk.bf16.vlgmr.msra.gmra.mxu0 %vm222_vm0, %v1004_v54 }
  0x3d   : >> { %1034 = vmatmul.msk.bf16.vlgmr.msra.gmra.mxu2 %vm222_vm0, %v558_v62 }
  0x3e   : >> { %1047 = vmatmul.msk.bf16.vlgmr.msra.gmra.mxu3 %vm222_vm0, %v598_v63 }
  0x44   : >> { %1067 = vmatmul.msk.bf16.vlgmr.msrb.gmra.mxu1 %vm222_vm0, %v1060_v7 }
  0x46   : >> { %1057 = vmatmul.msk.bf16.vlgmr.msrb.gmra.mxu0 %vm222_vm0, %v1050_v6 }
  0x4d   : >> { %1080 = vmatmul.msk.bf16.vlgmr.msrb.gmra.mxu2 %vm222_vm0, %v698_v14 }
  0x4e   : >> { %1093 = vmatmul.msk.bf16.vlgmr.msrb.gmra.mxu3 %vm222_vm0, %v738_v15 }
  0x91   : >> { %v257_v17 = vpop.f32.mrf.mxu1 }
  0x93   : >> { %v235_v16 = vpop.f32.mrf.mxu0 }
  0x94   : >> { %v258_v24 = vadd.f32 %v257_v17, %v235_v16 }
  0x99   : >> { %v259_v19 = vpop.f32.mrf.mxu1 }
  0x9b   : >> { %v237_v18 = vpop.f32.mrf.mxu0 }
  0xa0   : >> { %v296_v20 = vpop.f32.mrf.mxu2 }
  0xa1   : >> { %v336_v21 = vpop.f32.mrf.mxu3  ;;  %v396_v23 = vpop.f32.mrf.mxu1  ;;  %v300_v25 = vadd.f32 %v296_v20, %v258_v24 }
  0xa3   : >> { %v366_v22 = vpop.f32.mrf.mxu0  ;;  %v340_v30 = vadd.f32 %v336_v21, %v300_v25 }
  0xa5   : >> { %v370_v31 = vadd.f32 %v366_v22, %v340_v30 }
  0xa7   : >> { %v400_v36 = vadd.f32 %v396_v23, %v370_v31 }
  0xa8   : >> { %v298_v26 = vpop.f32.mrf.mxu2 }
  0xa9   : >> { %v338_v27 = vpop.f32.mrf.mxu3  ;;  %v398_v29 = vpop.f32.mrf.mxu1 }
  0xab   : >> { %v368_v28 = vpop.f32.mrf.mxu0 }
  0xb0   : >> { %v436_v32 = vpop.f32.mrf.mxu2 }
  0xb1   : >> { %v476_v33 = vpop.f32.mrf.mxu3  ;;  %v537_v35 = vpop.f32.mrf.mxu1  ;;  %v440_v37 = vadd.f32 %v436_v32, %v400_v36 }
  0xb3   : >> { %v507_v34 = vpop.f32.mrf.mxu0  ;;  %v480_v40 = vadd.f32 %v476_v33, %v440_v37 }
  0xb5   : >> { %v511_v43 = vadd.f32 %v507_v34, %v480_v40 }
  0xb7   : >> { %v541_v46 = vadd.f32 %v537_v35, %v511_v43 }
  0xb8   : >> { %v438_v38 = vpop.f32.mrf.mxu2 }
  0xb9   : >> { %v478_v39 = vpop.f32.mrf.mxu3  ;;  %v539_v42 = vpop.f32.mrf.mxu1 }
  0xbb   : >> { %v509_v41 = vpop.f32.mrf.mxu0 }
  0xc0   : >> { %v577_v44 = vpop.f32.mrf.mxu2 }
  0xc1   : >> { %v617_v45 = vpop.f32.mrf.mxu3  ;;  %v677_v48 = vpop.f32.mrf.mxu1  ;;  %v581_v49 = vadd.f32 %v577_v44, %v541_v46 }
  0xc3   : >> { %v647_v47 = vpop.f32.mrf.mxu0  ;;  %v621_v50 = vadd.f32 %v617_v45, %v581_v49 }
  0xc5   : >> { %v651_v55 = vadd.f32 %v647_v47, %v621_v50 }
  0xc7   : >> { %v681_v56 = vadd.f32 %v677_v48, %v651_v55 }
  0xc8   : >> { %v579_v51 = vpop.f32.mrf.mxu2 }
  0xc9   : >> { %v619_v52 = vpop.f32.mrf.mxu3  ;;  %v679_v54 = vpop.f32.mrf.mxu1 }
  0xcb   : >> { %v649_v53 = vpop.f32.mrf.mxu0 }
  0xd0   : >> { %v717_v57 = vpop.f32.mrf.mxu2 }
  0xd1   : >> { %v757_v58 = vpop.f32.mrf.mxu3  ;;  %v721_v59 = vadd.f32 %v717_v57, %v681_v56 }
  0xd3   : >> { %v761_v61 = vadd.f32 %v757_v58, %v721_v59 }
  0xd5   : >> { %v766_v62 = vadd.f32 %v1162_v60, %v761_v61 }
  0xd7   : >> { %vm767_vm1 = vcmp.ge.f32.partialorder %v766_v62, 0.0  ;;  %v768_v63 = vmul.f32 0.2, %v766_v62 }
  0xd8   : >> { %v719_v0 = vpop.f32.mrf.mxu2  ;;  %199 = sbr.rel (!%p197_p5) target bundleno = 16 (0x10), region = 93 }
  0xd9   : >> { %v759_v1 = vpop.f32.mrf.mxu3  ;;  %v769_v2 = vsel %vm767_vm1, %v766_v62, %v768_v63 }
  0xda   : >> { %v770_v3 = vpack.c.bf16 %v769_v2, %v769_v2 }
  0xdc   : >> { %774 = vst.msk [vmem:[%s772_s17] sm:$0xf] %vm773_vm2, %v770_v3 }
  0xdd PF: > { %s13_s14 = sadd.s32 1, %s1189_s14   ;;  %s1361_s12 = smov %s1185_s13 }
  0xde   : > { %p10_p6 = scmp.ge.s32.totalorder %s13_s14, 4   ;;  %s1362_s13 = smov %s1364_s15 }
  0xe0   :  { %12 = sbr.rel (!%p10_p6) target bundleno = 2 (0x2), region = 104 }

// kernel: reverse
= control target key start
LH: loop header
LB: loop body
LE: loop exit
PB: predicated region body
PF: predicated region fallthrough
CT: control target
= control target key end

     0   :  { %s125_s0 = inlined_call_operand.vmem [shape: f32[1,128,3,3], index: 0, kind: input, shape index: {}]   ;;  %s126_s1 = inlined_call_operand.vmem [shape: bf16[1,128,3,3], index: 1, kind: output, shape index: {}]  }
   0x1   :  { %v45_v0 = vld [vmem:[%s125_s0 + $0x8] sm:$0x1]  ;;  %v46_v1 = vld [vmem:[%s125_s0 + $0x5] sm:$0x1]  ;;  %v48_v2 = vld [vmem:[%s125_s0 + $0x2] sm:$0x1] }
   0x2   :  { %v4_v3 = vpack.c.bf16 0.0, %v45_v0  ;;  %v9_v4 = vpack.c.bf16 0.0, %v46_v1  ;;  %v14_v5 = vpack.c.bf16 0.0, %v48_v2  ;;  %v50_v6 = vld [vmem:[%s125_s0 + $0x7] sm:$0x1] }
   0x3   :  { %v19_v7 = vpack.c.bf16 0.0, %v50_v6  ;;  %v52_v8 = vld [vmem:[%s125_s0 + $0x4] sm:$0x1]  ;;  %v54_v9 = vld [vmem:[%s125_s0 + $0x1] sm:$0x1] }
   0x4   :  { %5 = vst [vmem:[%s126_s1] sm:$0x1] %v4_v3  ;;  %v24_v10 = vpack.c.bf16 0.0, %v52_v8  ;;  %v56_v11 = vld [vmem:[%s125_s0 + $0x6] sm:$0x1]  ;;  %v29_v12 = vpack.c.bf16 0.0, %v54_v9 }
   0x5   :  { %47 = vst [vmem:[%s126_s1 + $0x3] sm:$0x1] %v9_v4  ;;  %v58_v13 = vld [vmem:[%s125_s0 + $0x3] sm:$0x1]  ;;  %v34_v14 = vpack.c.bf16 0.0, %v56_v11 }
   0x6   :  { %49 = vst [vmem:[%s126_s1 + $0x6] sm:$0x1] %v14_v5  ;;  %v41_v15 = vld [vmem:[%s125_s0] sm:$0x1]  ;;  %v39_v16 = vpack.c.bf16 0.0, %v58_v13 }
   0x7   :  { %51 = vst [vmem:[%s126_s1 + $0x1] sm:$0x1] %v19_v7  ;;  %v43_v17 = vpack.c.bf16 0.0, %v41_v15 }
   0x8   :  { %53 = vst [vmem:[%s126_s1 + $0x4] sm:$0x1] %v24_v10 }
   0x9   :  { %55 = vst [vmem:[%s126_s1 + $0x7] sm:$0x1] %v29_v12 }
   0xa   :  { %57 = vst [vmem:[%s126_s1 + $0x2] sm:$0x1] %v34_v14 }
   0xb   :  { %59 = vst [vmem:[%s126_s1 + $0x5] sm:$0x1] %v39_v16 }
   0xc   :  { %60 = vst [vmem:[%s126_s1 + $0x8] sm:$0x1] %v43_v17 }

// kernel: fdiscriminator_forward.4
= control target key start
LH: loop header
LB: loop body
LE: loop exit
PB: predicated region body
PF: predicated region fallthrough
CT: control target
= control target key end

     0   :  { %s1360_s12 = smov 0   ;;  %s1362_s13 = smov 0   ;;  %s1542_s0 = inlined_call_operand.vmem [shape: bf16[2,4,5,5,32], index: 0, kind: input, shape index: {}]   ;;  %s1543_s1 = inlined_call_operand.vmem [shape: bf16[16,32,64], index: 1, kind: input, shape index: {}]   ;;  %s1544_s2 = inlined_call_operand.vmem [shape: f32[1,64], index: 2, kind: input, shape index: {}]   ;;  %s1545_s3 = inlined_call_operand.vmem [shape: bf16[2,4,4,64], index: 3, kind: output, shape index: {}]  }
   0x1   :  { %s1364_s14 = smov 0  }
   0x2 LB: > { %s25_s15 = sadd.s32 1, %s1330_s13  ;;  %p1008_p0 = scmp.ge.s32.totalorder %s1334_s14, 1  ;;  %s1334_s14 = sphi %s1364_s14, %s13_s14   ;;  %s1330_s13 = sphi %s1362_s13, %s1547_s13   ;;  %s1326_s12 = sphi %s1360_s12, %s1546_s12  }
   0x3   : > { %p27_p1 = scmp.ge.s32.totalorder %s25_s15, 2  ;;  %p151_p2 = scmp.lt.s32.totalorder %s1334_s14, 3 }
   0x5   : > { %s1549_s15 = smov (%p27_p1, %s25_s15), 0  ;;  %p152_p3 = pnand %p1008_p0, %p151_p2 }
   0x6   : > { %p179_p4 = scmp.lt.s32.totalorder (!%p152_p3), %s1326_s12, 1  ;;  %s1388_s24 = smov (!%p152_p3), 0  }
   0x7   : > { %155 = sbr.rel (%p152_p3) target bundleno = 223 (0xdf), region = 32 }
   0xc   : > { %s1551_s12 = smov (!%p179_p4, %s1326_s12), 1 }
   0xd   : > { %s1274_s16 = smul.u32 80, %s1551_s12  ;;  %s1241_s17 = sshll.u32 %s1551_s12, 3 }
   0xe   : > { %s1381_s20 = scalar_lea.vmem %s1545_s3, %s1241_s17 }
   0xf   : > { %s1386_s23 = scalar_lea.vmem %s1542_s0, %s1274_s16 }
  0x10 LB: >> { %v1245_v0 = vld [vmem:[%s1543_s1 + $0x18] sm:$0xff]  ;;  %v1243_v1 = vld [vmem:[%s1543_s1 + $0x8] sm:$0xff]  ;;  %v1244_v4 = vld [vmem:[%s1543_s1 + $0x10] sm:$0xff]  ;;  %s1012_s10 = sshll.u32 %s1338_s24, 2  ;;  %vm231_vm0 = vcmask 261120   ;;  %s1238_s4 = sshll.u32 %s1338_s24, 1  ;;  %s1338_s24 = sphi %s1388_s24, %s200_s24  }
  0x11   : >> { %v1247_v2 = vld [vmem:[%s1543_s1 + $0x28] sm:$0xff]  ;;  %v1249_v3 = vld [vmem:[%s1543_s1 + $0x38] sm:$0xff]  ;;  %241 = vmatpush.bf16.msra.mxu0 %v1245_v0  ;;  %269 = vmatpush.bf16.msra.mxu1 %v1243_v1  ;;  %v1242_v5 = vld [vmem:[%s1543_s1] sm:$0xff]  ;;  %s1413_s11 = scalar_lea.vmem %s1386_s23, %s1012_s10  ;;  %s874_s5 = scalar_lea.vmem %s1381_s20, %s1238_s4  ;;  %vm875_vm2 = vcmask 517120  }
  0x12   : >> { %313 = vmatpush.bf16.msra.mxu2 %v1247_v2  ;;  %358 = vmatpush.bf16.msra.mxu3 %v1249_v3  ;;  %v1246_v6 = vld [vmem:[%s1543_s1 + $0x20] sm:$0xff]  ;;  %v1248_v7 = vld [vmem:[%s1543_s1 + $0x30] sm:$0xff]  ;;  %v1255_v9 = vld [vmem:[%s1543_s1 + $0x68] sm:$0xff]  ;;  %s200_s24 = sadd.s32 1, %s1338_s24  }
  0x13   : >> { %v276_v8 = vld [vmem:[%s1413_s11] sm:$0x7]  ;;  %v1251_v10 = vld [vmem:[%s1543_s1 + $0x48] sm:$0xff]  ;;  %v1050_v12 = vld [vmem:[%s1413_s11 + $0x14] sm:$0x7]  ;;  %p197_p5 = scmp.ge.s32.totalorder %s200_s24, 4  }
  0x14   : >> { %v283_v11 = vunpack.c.l.b16 %v276_v8  ;;  %v1257_v13 = vld [vmem:[%s1543_s1 + $0x78] sm:$0xff]  ;;  %v1014_v14 = vld [vmem:[%s1413_s11 + $0x14] sm:$0x3]  ;;  %v205_v15 = vld [vmem:[%s1413_s11] sm:$0x3]  ;;  %v328_v16 = vunpack.c.l.b16 %v1050_v12 }
  0x15   : >> { %242 = vmatpush.bf16.msra.mxu0 %v1244_v4  ;;  %270 = vmatpush.bf16.msra.mxu1 %v1242_v5  ;;  %v1253_v17 = vld [vmem:[%s1543_s1 + $0x58] sm:$0xff]  ;;  %v1250_v20 = vld [vmem:[%s1543_s1 + $0x40] sm:$0xff]  ;;  %v1094_v22 = vld [vmem:[%s1413_s11 + $0x28] sm:$0x7] }
  0x16   : >> { %314 = vmatpush.bf16.msra.mxu2 %v1246_v6  ;;  %359 = vmatpush.bf16.msra.mxu3 %v1248_v7  ;;  %v284_v18 = vpack.c.b16 %v283_v11, %v283_v11  ;;  %v329_v19 = vpack.c.b16 %v328_v16, %v328_v16  ;;  %v1254_v21 = vld [vmem:[%s1543_s1 + $0x60] sm:$0xff]  ;;  %v1108_v25 = vld [vmem:[%s1413_s11 + $0x3c] sm:$0x7]  ;;  %v1259_v26 = vld [vmem:[%s1543_s1 + $0x88] sm:$0xff]  ;;  %v449_v32 = vunpack.c.l.b16 %v1094_v22 }
  0x17   : >> { %v1252_v29 = vld [vmem:[%s1543_s1 + $0x50] sm:$0xff]  ;;  %v1261_v33 = vld [vmem:[%s1543_s1 + $0x98] sm:$0xff]  ;;  %v494_v35 = vunpack.c.l.b16 %v1108_v25  ;;  %v1263_v36 = vld [vmem:[%s1543_s1 + $0xa8] sm:$0xff] }
  0x18   : >> { %1027 = vmatmul.msk.bf16.vlgmr.msra.gmra.mxu0 %vm231_vm0, %v1014_v14  ;;  %1036 = vmatmul.msk.bf16.vlgmr.msra.gmra.mxu1 %vm231_vm0, %v205_v15  ;;  %v286_v23 = vshrl.u32 %v284_v18, 16  ;;  %v288_v24 = vshll.u32 %v284_v18, 16  ;;  %v331_v27 = vshrl.u32 %v329_v19, 16  ;;  %v333_v28 = vshll.u32 %v329_v19, 16  ;;  %v1256_v30 = vld [vmem:[%s1543_s1 + $0x70] sm:$0xff]  ;;  %v1265_v38 = vld [vmem:[%s1543_s1 + $0xb8] sm:$0xff] }
  0x19   : >> { %396 = vmatpush.bf16.msrb.mxu0 %v1251_v10  ;;  %434 = vmatpush.bf16.msrb.mxu1 %v1253_v17  ;;  %v1258_v39 = vld [vmem:[%s1543_s1 + $0x80] sm:$0xff]  ;;  %v450_v41 = vpack.c.b16 %v449_v32, %v449_v32  ;;  %v1260_v42 = vld [vmem:[%s1543_s1 + $0x90] sm:$0xff]  ;;  %v495_v43 = vpack.c.b16 %v494_v35, %v494_v35  ;;  %v1065_v48 = vld [vmem:[%s1413_s11 + $0x28] sm:$0x3] }
  0x1a   : >> { %479 = vmatpush.bf16.msrb.mxu2 %v1255_v9  ;;  %524 = vmatpush.bf16.msrb.mxu3 %v1257_v13  ;;  %v290_v31 = vrot.slane %v288_v24, 1  ;;  %v335_v34 = vrot.slane %v333_v28, 1  ;;  %v1262_v44 = vld [vmem:[%s1543_s1 + $0xa0] sm:$0xff]  ;;  %v1264_v45 = vld [vmem:[%s1543_s1 + $0xb0] sm:$0xff]  ;;  %v1080_v49 = vld [vmem:[%s1413_s11 + $0x3c] sm:$0x3] }
  0x1b   : >> { %v454_v46 = vshll.u32 %v450_v41, 16  ;;  %v499_v47 = vshll.u32 %v495_v43, 16  ;;  %v1267_v50 = vld [vmem:[%s1543_s1 + $0xc8] sm:$0xff]  ;;  %v1269_v51 = vld [vmem:[%s1543_s1 + $0xd8] sm:$0xff]  ;;  %v452_v52 = vshrl.u32 %v450_v41, 16  ;;  %v497_v54 = vshrl.u32 %v495_v43, 16 }
  0x1c   : >> { %v291_v37 = vor.u32 %v290_v31, %v286_v23  ;;  %v336_v40 = vor.u32 %v335_v34, %v331_v27  ;;  %v1152_v56 = vld [vmem:[%s1413_s11 + $0x4] sm:$0x7]  ;;  %v1166_v57 = vld [vmem:[%s1413_s11 + $0x18] sm:$0x7]  ;;  %v1268_v59 = vld [vmem:[%s1543_s1 + $0xd0] sm:$0xff] }
  0x1d   : >> { %397 = vmatpush.bf16.msrb.mxu0 %v1250_v20  ;;  %435 = vmatpush.bf16.msrb.mxu1 %v1252_v29  ;;  %v456_v53 = vrot.slane %v454_v46, 1  ;;  %v501_v55 = vrot.slane %v499_v47, 1  ;;  %v1266_v58 = vld [vmem:[%s1543_s1 + $0xc0] sm:$0xff]  ;;  %v615_v61 = vunpack.c.l.b16 %v1152_v56  ;;  %v660_v63 = vunpack.c.l.b16 %v1166_v57  ;;  %v1271_v0 = vld [vmem:[%s1543_s1 + $0xe8] sm:$0xff]  ;;  %v1273_v1 = vld [vmem:[%s1543_s1 + $0xf8] sm:$0xff] }
  0x1e   : >> { %480 = vmatpush.bf16.msrb.mxu2 %v1254_v21  ;;  %525 = vmatpush.bf16.msrb.mxu3 %v1256_v30  ;;  %v1270_v4 = vld [vmem:[%s1543_s1 + $0xe0] sm:$0xff]  ;;  %v1272_v5 = vld [vmem:[%s1543_s1 + $0xf0] sm:$0xff]  ;;  %v1138_v9 = vld [vmem:[%s1413_s11 + $0x18] sm:$0x3] }
  0x1f   : >> { %1049 = vmatmul.msk.bf16.vlgmr.msra.gmra.mxu2 %vm231_vm0, %v291_v37  ;;  %1063 = vmatmul.msk.bf16.vlgmr.msra.gmra.mxu3 %vm231_vm0, %v336_v40  ;;  %v457_v60 = vor.u32 %v456_v53, %v452_v52  ;;  %v502_v62 = vor.u32 %v501_v55, %v497_v54  ;;  %v616_v2 = vpack.c.b16 %v615_v61, %v615_v61  ;;  %v1123_v8 = vld [vmem:[%s1413_s11 + $0x4] sm:$0x3]  ;;  %v1210_v14 = vld [vmem:[%s1413_s11 + $0x2c] sm:$0x7]  ;;  %v1224_v15 = vld [vmem:[%s1413_s11 + $0x40] sm:$0x7] }
  0x20   : >> { %v661_v3 = vpack.c.b16 %v660_v63, %v660_v63  ;;  %v781_v17 = vunpack.c.l.b16 %v1210_v14  ;;  %v826_v19 = vunpack.c.l.b16 %v1224_v15  ;;  %v1181_v24 = vld [vmem:[%s1413_s11 + $0x2c] sm:$0x3]  ;;  %v1196_v25 = vld [vmem:[%s1413_s11 + $0x40] sm:$0x3] }
  0x21   : >> { %562 = vmatpush.bf16.msra.mxu0 %v1259_v26  ;;  %600 = vmatpush.bf16.msra.mxu1 %v1261_v33  ;;  %v620_v6 = vshll.u32 %v616_v2, 16  ;;  %v618_v10 = vshrl.u32 %v616_v2, 16 }
  0x22   : >> { %645 = vmatpush.bf16.msra.mxu2 %v1263_v36  ;;  %690 = vmatpush.bf16.msra.mxu3 %v1265_v38  ;;  %v665_v7 = vshll.u32 %v661_v3, 16  ;;  %v663_v12 = vshrl.u32 %v661_v3, 16  ;;  %v782_v20 = vpack.c.b16 %v781_v17, %v781_v17  ;;  %v827_v21 = vpack.c.b16 %v826_v19, %v826_v19 }
  0x23   : >> { %v622_v11 = vrot.slane %v620_v6, 1 }
  0x24   : >> { %v667_v13 = vrot.slane %v665_v7, 1  ;;  %v786_v22 = vshll.u32 %v782_v20, 16  ;;  %v831_v23 = vshll.u32 %v827_v21, 16  ;;  %v784_v26 = vshrl.u32 %v782_v20, 16 }
  0x25   : >> { %563 = vmatpush.bf16.msra.mxu0 %v1258_v39  ;;  %601 = vmatpush.bf16.msra.mxu1 %v1260_v42  ;;  %v623_v16 = vor.u32 %v622_v11, %v618_v10  ;;  %v829_v28 = vshrl.u32 %v827_v21, 16 }
  0x26   : >> { %646 = vmatpush.bf16.msra.mxu2 %v1262_v44  ;;  %691 = vmatpush.bf16.msra.mxu3 %v1264_v45  ;;  %v668_v18 = vor.u32 %v667_v13, %v663_v12  ;;  %v788_v27 = vrot.slane %v786_v22, 1  ;;  %v833_v29 = vrot.slane %v831_v23, 1  ;;  %v1307_v12 = vld [vmem:[%s1544_s2] ss:$0 sm:$0xff] }
  0x28   : >> { %1078 = vmatmul.msk.bf16.vlgmr.msrb.gmra.mxu0 %vm231_vm0, %v1065_v48  ;;  %1093 = vmatmul.msk.bf16.vlgmr.msrb.gmra.mxu1 %vm231_vm0, %v1080_v49  ;;  %v789_v30 = vor.u32 %v788_v27, %v784_v26  ;;  %v834_v31 = vor.u32 %v833_v29, %v829_v28 }
  0x29   : >> { %728 = vmatpush.bf16.msrb.mxu0 %v1267_v50  ;;  %766 = vmatpush.bf16.msrb.mxu1 %v1269_v51 }
  0x2d   : >> { %729 = vmatpush.bf16.msrb.mxu0 %v1266_v58  ;;  %767 = vmatpush.bf16.msrb.mxu1 %v1268_v59 }
  0x2f   : >> { %1107 = vmatmul.msk.bf16.vlgmr.msrb.gmra.mxu2 %vm231_vm0, %v457_v60  ;;  %1121 = vmatmul.msk.bf16.vlgmr.msrb.gmra.mxu3 %vm231_vm0, %v502_v62 }
  0x30   : >> { %811 = vmatpush.bf16.msrb.mxu2 %v1271_v0  ;;  %856 = vmatpush.bf16.msrb.mxu3 %v1273_v1 }
  0x34   : >> { %812 = vmatpush.bf16.msrb.mxu2 %v1270_v4  ;;  %857 = vmatpush.bf16.msrb.mxu3 %v1272_v5 }
  0x38   : >> { %1136 = vmatmul.msk.bf16.vlgmr.msra.gmra.mxu0 %vm231_vm0, %v1123_v8  ;;  %1151 = vmatmul.msk.bf16.vlgmr.msra.gmra.mxu1 %vm231_vm0, %v1138_v9 }
  0x3f   : >> { %1165 = vmatmul.msk.bf16.vlgmr.msra.gmra.mxu2 %vm231_vm0, %v623_v16  ;;  %1179 = vmatmul.msk.bf16.vlgmr.msra.gmra.mxu3 %vm231_vm0, %v668_v18 }
  0x48   : >> { %1194 = vmatmul.msk.bf16.vlgmr.msrb.gmra.mxu0 %vm231_vm0, %v1181_v24  ;;  %1209 = vmatmul.msk.bf16.vlgmr.msrb.gmra.mxu1 %vm231_vm0, %v1196_v25 }
  0x4f   : >> { %1223 = vmatmul.msk.bf16.vlgmr.msrb.gmra.mxu2 %vm231_vm0, %v789_v30  ;;  %1237 = vmatmul.msk.bf16.vlgmr.msrb.gmra.mxu3 %vm231_vm0, %v834_v31 }
  0x95   : >> { %v244_v32 = vpop.f32.mrf.mxu0  ;;  %v272_v33 = vpop.f32.mrf.mxu1 }
  0x96   : >> { %v273_v40 = vadd.f32 %v272_v33, %v244_v32 }
  0x9d   : >> { %v246_v34 = vpop.f32.mrf.mxu0  ;;  %v274_v35 = vpop.f32.mrf.mxu1 }
  0xa2   : >> { %v316_v36 = vpop.f32.mrf.mxu2  ;;  %v361_v37 = vpop.f32.mrf.mxu3 }
  0xa3   : >> { %v320_v41 = vadd.f32 %v316_v36, %v273_v40 }
  0xa5   : >> { %v399_v38 = vpop.f32.mrf.mxu0  ;;  %v437_v39 = vpop.f32.mrf.mxu1  ;;  %v365_v44 = vadd.f32 %v361_v37, %v320_v41 }
  0xa7   : >> { %v403_v47 = vadd.f32 %v399_v38, %v365_v44 }
  0xa9   : >> { %v441_v50 = vadd.f32 %v437_v39, %v403_v47 }
  0xaa   : >> { %v318_v42 = vpop.f32.mrf.mxu2  ;;  %v363_v43 = vpop.f32.mrf.mxu3 }
  0xad   : >> { %v401_v45 = vpop.f32.mrf.mxu0  ;;  %v439_v46 = vpop.f32.mrf.mxu1 }
  0xb2   : >> { %v482_v48 = vpop.f32.mrf.mxu2  ;;  %v527_v49 = vpop.f32.mrf.mxu3 }
  0xb3   : >> { %v486_v53 = vadd.f32 %v482_v48, %v441_v50 }
  0xb5   : >> { %v565_v51 = vpop.f32.mrf.mxu0  ;;  %v603_v52 = vpop.f32.mrf.mxu1  ;;  %v531_v55 = vadd.f32 %v527_v49, %v486_v53 }
  0xb7   : >> { %v569_v59 = vadd.f32 %v565_v51, %v531_v55 }
  0xb9   : >> { %v607_v61 = vadd.f32 %v603_v52, %v569_v59 }
  0xba   : >> { %v484_v54 = vpop.f32.mrf.mxu2  ;;  %v529_v56 = vpop.f32.mrf.mxu3 }
  0xbd   : >> { %v567_v57 = vpop.f32.mrf.mxu0  ;;  %v605_v58 = vpop.f32.mrf.mxu1 }
  0xc2   : >> { %v648_v60 = vpop.f32.mrf.mxu2  ;;  %v693_v62 = vpop.f32.mrf.mxu3 }
  0xc3   : >> { %v652_v63 = vadd.f32 %v648_v60, %v607_v61 }
  0xc5   : >> { %v731_v0 = vpop.f32.mrf.mxu0  ;;  %v769_v1 = vpop.f32.mrf.mxu1  ;;  %v697_v2 = vadd.f32 %v693_v62, %v652_v63 }
  0xc7   : >> { %v735_v5 = vadd.f32 %v731_v0, %v697_v2 }
  0xc9   : >> { %v773_v8 = vadd.f32 %v769_v1, %v735_v5 }
  0xca   : >> { %v650_v3 = vpop.f32.mrf.mxu2  ;;  %v695_v4 = vpop.f32.mrf.mxu3 }
  0xcd   : >> { %v733_v6 = vpop.f32.mrf.mxu0  ;;  %v771_v7 = vpop.f32.mrf.mxu1 }
  0xd2   : >> { %v814_v9 = vpop.f32.mrf.mxu2  ;;  %v859_v11 = vpop.f32.mrf.mxu3 }
  0xd3   : >> { %v818_v10 = vadd.f32 %v814_v9, %v773_v8 }
  0xd5   : >> { %v863_v13 = vadd.f32 %v859_v11, %v818_v10 }
  0xd7   : >> { %v868_v14 = vadd.f32 %v1307_v12, %v863_v13 }
  0xd9   : >> { %vm869_vm1 = vcmp.ge.f32.partialorder %v868_v14, 0.0  ;;  %v870_v15 = vmul.f32 0.2, %v868_v14 }
  0xda   : >> { %v816_v16 = vpop.f32.mrf.mxu2  ;;  %v861_v18 = vpop.f32.mrf.mxu3  ;;  %199 = sbr.rel (!%p197_p5) target bundleno = 16 (0x10), region = 93 }
  0xdb   : >> { %v871_v17 = vsel %vm869_vm1, %v868_v14, %v870_v15 }
  0xdc   : >> { %v872_v19 = vpack.c.bf16 %v871_v17, %v871_v17 }
  0xde   : >> { %876 = vst.msk [vmem:[%s874_s5] sm:$0x3] %vm875_vm2, %v872_v19 }
  0xdf PF: > { %s13_s14 = sadd.s32 1, %s1334_s14   ;;  %s1546_s12 = smov %s1330_s13 }
  0xe0   : > { %p10_p6 = scmp.ge.s32.totalorder %s13_s14, 4   ;;  %s1547_s13 = smov %s1549_s15 }
  0xe2   :  { %12 = sbr.rel (!%p10_p6) target bundleno = 2 (0x2), region = 104 }

// kernel: fdiscriminator_forward.5
= control target key start
LH: loop header
LB: loop body
LE: loop exit
PB: predicated region body
PF: predicated region fallthrough
CT: control target
= control target key end

     0   :  { %s1814_s12 = smov 0   ;;  %s1816_s13 = smov 0   ;;  %s2092_s0 = inlined_call_operand.vmem [shape: bf16[2,4,3,3,64], index: 0, kind: input, shape index: {}]   ;;  %s2093_s1 = inlined_call_operand.vmem [shape: bf16[16,64,128], index: 1, kind: input, shape index: {}]   ;;  %s2094_s2 = inlined_call_operand.vmem [shape: f32[1,128], index: 2, kind: input, shape index: {}]   ;;  %s2095_s3 = inlined_call_operand.vmem [shape: bf16[2,2,2,128], index: 3, kind: output, shape index: {}]  }
   0x1   :  { %s1818_s14 = smov 0  }
   0x2 LB: > { %s25_s15 = sadd.s32 1, %s1784_s13  ;;  %p1245_p0 = scmp.ge.s32.totalorder %s1788_s14, 1  ;;  %s1788_s14 = sphi %s1818_s14, %s13_s14   ;;  %s1784_s13 = sphi %s1816_s13, %s2097_s13   ;;  %s1780_s12 = sphi %s1814_s12, %s2096_s12  }
   0x3   : > { %p27_p1 = scmp.ge.s32.totalorder %s25_s15, 2  ;;  %p151_p2 = scmp.lt.s32.totalorder %s1788_s14, 3 }
   0x5   : > { %s2099_s15 = smov (%p27_p1, %s25_s15), 0  ;;  %p152_p3 = pnand %p1245_p0, %p151_p2 }
   0x6   : > { %p178_p4 = scmp.lt.s32.totalorder (!%p152_p3), %s1780_s12, 1  ;;  %s1842_s24 = smov (!%p152_p3), 0  }
   0x7   : > { %155 = sbr.rel (%p152_p3) target bundleno = 231 (0xe7), region = 32 }
   0xc   : > { %s2101_s12 = smov (!%p178_p4, %s1780_s12), 1 }
   0xd   : > { %s1728_s16 = smul.u32 24, %s2101_s12  ;;  %s1247_s17 = sshll.u32 %s2101_s12, 1 }
   0xe   : > { %s1835_s20 = scalar_lea.vmem %s2095_s3, %s1247_s17 }
   0xf   : > { %s1840_s23 = scalar_lea.vmem %s2092_s0, %s1728_s16 }
  0x10 LB: >> { %v1671_v0 = vld [vmem:[%s2093_s1 + $0x38] sm:$0xff]  ;;  %v1670_v3 = vld [vmem:[%s2093_s1 + $0x30] sm:$0xff]  ;;  %s1248_s10 = sshll.u32 %s1792_s24, 1  ;;  %v1669_v9 = vld [vmem:[%s2093_s1 + $0x28] sm:$0xff]  ;;  %vm249_vm0 = vcmask 523264   ;;  %s1119_s8 = scalar_lea.vmem %s1835_s20, %s1792_s24  ;;  %s1792_s24 = sphi %s1842_s24, %s198_s24  }
  0x11   : >> { %v1675_v1 = vld [vmem:[%s2093_s1 + $0x58] sm:$0xff]  ;;  %257 = vmatpush.bf16.msra.mxu0 %v1671_v0  ;;  %v1674_v4 = vld [vmem:[%s2093_s1 + $0x50] sm:$0xff]  ;;  %s1870_s16 = scalar_lea.vmem %s1840_s23, %s1248_s10  ;;  %v1673_v10 = vld [vmem:[%s2093_s1 + $0x48] sm:$0xff]  ;;  %s198_s24 = sadd.s32 1, %s1792_s24  }
  0x12   : >> { %v1667_v2 = vld [vmem:[%s2093_s1 + $0x18] sm:$0xff]  ;;  %356 = vmatpush.bf16.msra.mxu2 %v1675_v1  ;;  %v1666_v6 = vld [vmem:[%s2093_s1 + $0x10] sm:$0xff]  ;;  %v306_v8 = vld [vmem:[%s1870_s16] sm:$0x3]  ;;  %p195_p5 = scmp.ge.s32.totalorder %s198_s24, 2  }
  0x13   : >> { %v1679_v5 = vld [vmem:[%s2093_s1 + $0x78] sm:$0xff]  ;;  %297 = vmatpush.bf16.msra.mxu1 %v1667_v2  ;;  %v1678_v7 = vld [vmem:[%s2093_s1 + $0x70] sm:$0xff]  ;;  %317 = vst [vmem:[#allocation1] ss:$4 sm:$0xff] %v306_v8  ;;  %v1665_v11 = vld [vmem:[%s2093_s1 + $0x8] sm:$0xff] }
  0x14   : >> { %416 = vmatpush.bf16.msra.mxu3 %v1679_v5  ;;  %v1677_v12 = vld [vmem:[%s2093_s1 + $0x68] sm:$0xff]  ;;  %v1668_v13 = vld [vmem:[%s2093_s1 + $0x20] sm:$0xff]  ;;  %v1683_v16 = vld [vmem:[%s2093_s1 + $0x98] sm:$0xff] }
  0x15   : >> { %258 = vmatpush.bf16.msra.mxu0 %v1670_v3  ;;  %v1672_v14 = vld [vmem:[%s2093_s1 + $0x40] sm:$0xff]  ;;  %v1691_v18 = vld [vmem:[%s2093_s1 + $0xd8] sm:$0xff]  ;;  %v1682_v27 = vld [vmem:[%s2093_s1 + $0x90] sm:$0xff] }
  0x16   : >> { %357 = vmatpush.bf16.msra.mxu2 %v1674_v4  ;;  %v1664_v15 = vld [vmem:[%s2093_s1] sm:$0xff]  ;;  %v1687_v19 = vld [vmem:[%s2093_s1 + $0xb8] sm:$0xff]  ;;  %v1686_v29 = vld [vmem:[%s2093_s1 + $0xb0] sm:$0xff] }
  0x17   : >> { %298 = vmatpush.bf16.msra.mxu1 %v1666_v6  ;;  %v1318_v17 = vld [vmem:[%s1870_s16 + $0x6] sm:$0x3]  ;;  %v1695_v25 = vld [vmem:[%s2093_s1 + $0xf8] sm:$0xff]  ;;  %v203_v26 = vld [vmem:[%s1870_s16] sm:$0x1] }
  0x18   : >> { %417 = vmatpush.bf16.msra.mxu3 %v1678_v7  ;;  %v1250_v20 = vld [vmem:[%s1870_s16 + $0x6] sm:$0x1]  ;;  %v1690_v30 = vld [vmem:[%s2093_s1 + $0xd0] sm:$0xff]  ;;  %v1398_v33 = vld [vmem:[%s1870_s16 + $0xc] sm:$0x3] }
  0x19   : >> { %259 = vmatpush.bf16.msra.mxu0 %v1669_v9  ;;  %v1676_v22 = vld [vmem:[%s2093_s1 + $0x60] sm:$0xff]  ;;  %v1694_v32 = vld [vmem:[%s2093_s1 + $0xf0] sm:$0xff]  ;;  %v1681_v34 = vld [vmem:[%s2093_s1 + $0x88] sm:$0xff] }
  0x1a   : >> { %358 = vmatpush.bf16.msra.mxu2 %v1673_v10  ;;  %v318_v21 = vld.sshfl [vmem:[#allocation1] sm:$0xff pattern:$0x73625140]  ;;  %v1685_v35 = vld [vmem:[%s2093_s1 + $0xa8] sm:$0xff]  ;;  %v1699_v45 = vld [vmem:[%s2093_s1 + $0x118] sm:$0xff] }
  0x1b   : >> { %299 = vmatpush.bf16.msra.mxu1 %v1665_v11  ;;  %v319_v23 = vshrl.u32 %v318_v21, 16  ;;  %v321_v24 = vshll.u32 %v318_v21, 16  ;;  %377 = vst [vmem:[#allocation1] ss:$4 sm:$0xff] %v1318_v17  ;;  %v1689_v37 = vld [vmem:[%s2093_s1 + $0xc8] sm:$0xff]  ;;  %v1680_v41 = vld [vmem:[%s2093_s1 + $0x80] sm:$0xff] }
  0x1c   : >> { %418 = vmatpush.bf16.msra.mxu3 %v1677_v12  ;;  %v1693_v40 = vld [vmem:[%s2093_s1 + $0xe8] sm:$0xff]  ;;  %v1684_v43 = vld [vmem:[%s2093_s1 + $0xa0] sm:$0xff]  ;;  %v1707_v47 = vld [vmem:[%s2093_s1 + $0x158] sm:$0xff] }
  0x1d   : >> { %260 = vmatpush.bf16.msra.mxu0 %v1668_v13  ;;  %v323_v28 = vrot.slane %v321_v24, 1  ;;  %v1688_v44 = vld [vmem:[%s2093_s1 + $0xc0] sm:$0xff]  ;;  %v1703_v48 = vld [vmem:[%s2093_s1 + $0x138] sm:$0xff]  ;;  %v1424_v49 = vld [vmem:[%s1870_s16 + $0x12] sm:$0x3] }
  0x1e   : >> { %359 = vmatpush.bf16.msra.mxu2 %v1672_v14  ;;  %v1692_v50 = vld [vmem:[%s2093_s1 + $0xe0] sm:$0xff]  ;;  %v1711_v51 = vld [vmem:[%s2093_s1 + $0x178] sm:$0xff]  ;;  %v1345_v52 = vld [vmem:[%s1870_s16 + $0xc] sm:$0x1] }
  0x1f   : >> { %300 = vmatpush.bf16.msra.mxu1 %v1664_v15  ;;  %v324_v31 = vor.u32 %v323_v28, %v319_v23  ;;  %v1698_v56 = vld [vmem:[%s2093_s1 + $0x110] sm:$0xff]  ;;  %v1697_v63 = vld [vmem:[%s2093_s1 + $0x108] sm:$0xff]  ;;  %v1504_v0 = vld [vmem:[%s1870_s16 + $0x2] sm:$0x3] }
  0x20   : >> { %1275 = vmatmul.msk.bf16.vlgmr.msra.gmra.mxu0 %vm249_vm0, %v1250_v20  ;;  %419 = vmatpush.bf16.msra.mxu3 %v1676_v22  ;;  %v1372_v57 = vld [vmem:[%s1870_s16 + $0x12] sm:$0x1]  ;;  %v1705_v1 = vld [vmem:[%s2093_s1 + $0x148] sm:$0xff]  ;;  %v1696_v7 = vld [vmem:[%s2093_s1 + $0x100] sm:$0xff] }
  0x21   : >> { %470 = vmatpush.bf16.msrb.mxu0 %v1683_v16  ;;  %1317 = vmatmul.msk.bf16.vlgmr.msra.gmra.mxu2 %vm249_vm0, %v324_v31  ;;  %v1706_v58 = vld [vmem:[%s2093_s1 + $0x150] sm:$0xff]  ;;  %v1701_v2 = vld [vmem:[%s2093_s1 + $0x128] sm:$0xff]  ;;  %v1704_v8 = vld [vmem:[%s2093_s1 + $0x140] sm:$0xff] }
  0x22   : >> { %584 = vmatpush.bf16.msrb.mxu2 %v1691_v18  ;;  %1292 = vmatmul.msk.bf16.vlgmr.msra.gmra.mxu1 %vm249_vm0, %v203_v26  ;;  %v378_v36 = vld.sshfl [vmem:[#allocation1] sm:$0xff pattern:$0x73625140]  ;;  %v1702_v59 = vld [vmem:[%s2093_s1 + $0x130] sm:$0xff]  ;;  %v1709_v3 = vld [vmem:[%s2093_s1 + $0x168] sm:$0xff] }
  0x23   : >> { %524 = vmatpush.bf16.msrb.mxu1 %v1687_v19  ;;  %v379_v38 = vshrl.u32 %v378_v36, 16  ;;  %v381_v39 = vshll.u32 %v378_v36, 16  ;;  %545 = vst [vmem:[#allocation1] ss:$4 sm:$0xff] %v1398_v33  ;;  %v1710_v61 = vld [vmem:[%s2093_s1 + $0x170] sm:$0xff]  ;;  %v1700_v9 = vld [vmem:[%s2093_s1 + $0x120] sm:$0xff] }
  0x24   : >> { %644 = vmatpush.bf16.msrb.mxu3 %v1695_v25  ;;  %v1715_v11 = vld [vmem:[%s2093_s1 + $0x198] sm:$0xff]  ;;  %v1708_v15 = vld [vmem:[%s2093_s1 + $0x160] sm:$0xff]  ;;  %v1530_v16 = vld [vmem:[%s1870_s16 + $0x8] sm:$0x3] }
  0x25   : >> { %471 = vmatpush.bf16.msrb.mxu0 %v1682_v27  ;;  %v383_v42 = vrot.slane %v381_v39, 1  ;;  %v1723_v12 = vld [vmem:[%s2093_s1 + $0x1d8] sm:$0xff]  ;;  %v1714_v18 = vld [vmem:[%s2093_s1 + $0x190] sm:$0xff]  ;;  %v1451_v21 = vld [vmem:[%s1870_s16 + $0x2] sm:$0x1] }
  0x26   : >> { %585 = vmatpush.bf16.msrb.mxu2 %v1690_v30  ;;  %v1719_v13 = vld [vmem:[%s2093_s1 + $0x1b8] sm:$0xff]  ;;  %v1722_v20 = vld [vmem:[%s2093_s1 + $0x1d0] sm:$0xff]  ;;  %v1478_v24 = vld [vmem:[%s1870_s16 + $0x8] sm:$0x1] }
  0x27   : >> { %525 = vmatpush.bf16.msrb.mxu1 %v1686_v29  ;;  %v384_v46 = vor.u32 %v383_v42, %v379_v38  ;;  %v1727_v17 = vld [vmem:[%s2093_s1 + $0x1f8] sm:$0xff]  ;;  %v1718_v25 = vld [vmem:[%s2093_s1 + $0x1b0] sm:$0xff]  ;;  %v1713_v28 = vld [vmem:[%s2093_s1 + $0x188] sm:$0xff] }
  0x28   : >> { %645 = vmatpush.bf16.msrb.mxu3 %v1694_v32  ;;  %v1726_v26 = vld [vmem:[%s2093_s1 + $0x1f0] sm:$0xff]  ;;  %v1721_v29 = vld [vmem:[%s2093_s1 + $0x1c8] sm:$0xff]  ;;  %v1720_v36 = vld [vmem:[%s2093_s1 + $0x1c0] sm:$0xff] }
  0x29   : >> { %472 = vmatpush.bf16.msrb.mxu0 %v1681_v34  ;;  %1343 = vmatmul.msk.bf16.vlgmr.msra.gmra.mxu3 %vm249_vm0, %v384_v46  ;;  %v1610_v31 = vld [vmem:[%s1870_s16 + $0xe] sm:$0x3]  ;;  %v1712_v34 = vld [vmem:[%s2093_s1 + $0x180] sm:$0xff] }
  0x2a   : >> { %586 = vmatpush.bf16.msrb.mxu2 %v1689_v37  ;;  %v546_v53 = vld.sshfl [vmem:[#allocation1] sm:$0xff pattern:$0x73625140]  ;;  %v1717_v32 = vld [vmem:[%s2093_s1 + $0x1a8] sm:$0xff] }
  0x2b   : >> { %526 = vmatpush.bf16.msrb.mxu1 %v1685_v35  ;;  %v547_v54 = vshrl.u32 %v546_v53, 16  ;;  %v549_v55 = vshll.u32 %v546_v53, 16  ;;  %605 = vst [vmem:[#allocation1] ss:$4 sm:$0xff] %v1424_v49  ;;  %v1725_v33 = vld [vmem:[%s2093_s1 + $0x1e8] sm:$0xff]  ;;  %v1716_v39 = vld [vmem:[%s2093_s1 + $0x1a0] sm:$0xff] }
  0x2c   : >> { %646 = vmatpush.bf16.msrb.mxu3 %v1693_v40  ;;  %v1724_v40 = vld [vmem:[%s2093_s1 + $0x1e0] sm:$0xff] }
  0x2d   : >> { %473 = vmatpush.bf16.msrb.mxu0 %v1680_v41  ;;  %v551_v60 = vrot.slane %v549_v55, 1 }
  0x2e   : >> { %587 = vmatpush.bf16.msrb.mxu2 %v1688_v44 }
  0x2f   : >> { %527 = vmatpush.bf16.msrb.mxu1 %v1684_v43  ;;  %v552_v62 = vor.u32 %v551_v60, %v547_v54  ;;  %v1636_v43 = vld [vmem:[%s1870_s16 + $0x14] sm:$0x3] }
  0x30   : >> { %647 = vmatpush.bf16.msrb.mxu3 %v1692_v50  ;;  %1370 = vmatmul.msk.bf16.vlgmr.msrb.gmra.mxu0 %vm249_vm0, %v1345_v52 }
  0x31   : >> { %698 = vmatpush.bf16.msra.mxu0 %v1699_v45  ;;  %1423 = vmatmul.msk.bf16.vlgmr.msrb.gmra.mxu2 %vm249_vm0, %v552_v62  ;;  %v1557_v45 = vld [vmem:[%s1870_s16 + $0xe] sm:$0x1] }
  0x32   : >> { %812 = vmatpush.bf16.msra.mxu2 %v1707_v47  ;;  %1397 = vmatmul.msk.bf16.vlgmr.msrb.gmra.mxu1 %vm249_vm0, %v1372_v57  ;;  %v606_v4 = vld.sshfl [vmem:[#allocation1] sm:$0xff pattern:$0x73625140] }
  0x33   : >> { %752 = vmatpush.bf16.msra.mxu1 %v1703_v48  ;;  %v607_v5 = vshrl.u32 %v606_v4, 16  ;;  %v609_v6 = vshll.u32 %v606_v4, 16  ;;  %773 = vst [vmem:[#allocation1] ss:$4 sm:$0xff] %v1504_v0  ;;  %v1584_v48 = vld [vmem:[%s1870_s16 + $0x14] sm:$0x1] }
  0x34   : >> { %872 = vmatpush.bf16.msra.mxu3 %v1711_v51 }
  0x35   : >> { %699 = vmatpush.bf16.msra.mxu0 %v1698_v56  ;;  %v611_v10 = vrot.slane %v609_v6, 1 }
  0x36   : >> { %813 = vmatpush.bf16.msra.mxu2 %v1706_v58 }
  0x37   : >> { %753 = vmatpush.bf16.msra.mxu1 %v1702_v59  ;;  %v612_v14 = vor.u32 %v611_v10, %v607_v5 }
  0x38   : >> { %873 = vmatpush.bf16.msra.mxu3 %v1710_v61 }
  0x39   : >> { %700 = vmatpush.bf16.msra.mxu0 %v1697_v63  ;;  %1449 = vmatmul.msk.bf16.vlgmr.msrb.gmra.mxu3 %vm249_vm0, %v612_v14 }
  0x3a   : >> { %814 = vmatpush.bf16.msra.mxu2 %v1705_v1  ;;  %v774_v19 = vld.sshfl [vmem:[#allocation1] sm:$0xff pattern:$0x73625140] }
  0x3b   : >> { %754 = vmatpush.bf16.msra.mxu1 %v1701_v2  ;;  %v775_v22 = vshrl.u32 %v774_v19, 16  ;;  %v777_v23 = vshll.u32 %v774_v19, 16  ;;  %833 = vst [vmem:[#allocation1] ss:$4 sm:$0xff] %v1530_v16 }
  0x3c   : >> { %874 = vmatpush.bf16.msra.mxu3 %v1709_v3 }
  0x3d   : >> { %701 = vmatpush.bf16.msra.mxu0 %v1696_v7  ;;  %v779_v27 = vrot.slane %v777_v23, 1 }
  0x3e   : >> { %815 = vmatpush.bf16.msra.mxu2 %v1704_v8 }
  0x3f   : >> { %755 = vmatpush.bf16.msra.mxu1 %v1700_v9  ;;  %v780_v30 = vor.u32 %v779_v27, %v775_v22 }
  0x40   : >> { %875 = vmatpush.bf16.msra.mxu3 %v1708_v15  ;;  %1476 = vmatmul.msk.bf16.vlgmr.msra.gmra.mxu0 %vm249_vm0, %v1451_v21 }
  0x41   : >> { %926 = vmatpush.bf16.msrb.mxu0 %v1715_v11  ;;  %1529 = vmatmul.msk.bf16.vlgmr.msra.gmra.mxu2 %vm249_vm0, %v780_v30 }
  0x42   : >> { %1040 = vmatpush.bf16.msrb.mxu2 %v1723_v12  ;;  %1503 = vmatmul.msk.bf16.vlgmr.msra.gmra.mxu1 %vm249_vm0, %v1478_v24  ;;  %v834_v35 = vld.sshfl [vmem:[#allocation1] sm:$0xff pattern:$0x73625140] }
  0x43   : >> { %980 = vmatpush.bf16.msrb.mxu1 %v1719_v13  ;;  %v835_v37 = vshrl.u32 %v834_v35, 16  ;;  %v837_v38 = vshll.u32 %v834_v35, 16  ;;  %1001 = vst [vmem:[#allocation1] ss:$4 sm:$0xff] %v1610_v31  ;;  %v1761_v35 = vld [vmem:[%s2094_s2] ss:$0 sm:$0xff] }
  0x44   : >> { %1100 = vmatpush.bf16.msrb.mxu3 %v1727_v17 }
  0x45   : >> { %927 = vmatpush.bf16.msrb.mxu0 %v1714_v18  ;;  %v839_v41 = vrot.slane %v837_v38, 1 }
  0x46   : >> { %1041 = vmatpush.bf16.msrb.mxu2 %v1722_v20 }
  0x47   : >> { %981 = vmatpush.bf16.msrb.mxu1 %v1718_v25  ;;  %v840_v42 = vor.u32 %v839_v41, %v835_v37 }
  0x48   : >> { %1101 = vmatpush.bf16.msrb.mxu3 %v1726_v26 }
  0x49   : >> { %928 = vmatpush.bf16.msrb.mxu0 %v1713_v28  ;;  %1555 = vmatmul.msk.bf16.vlgmr.msra.gmra.mxu3 %vm249_vm0, %v840_v42 }
  0x4a   : >> { %1042 = vmatpush.bf16.msrb.mxu2 %v1721_v29  ;;  %v1002_v44 = vld.sshfl [vmem:[#allocation1] sm:$0xff pattern:$0x73625140] }
  0x4b   : >> { %982 = vmatpush.bf16.msrb.mxu1 %v1717_v32  ;;  %v1003_v46 = vshrl.u32 %v1002_v44, 16  ;;  %v1005_v47 = vshll.u32 %v1002_v44, 16  ;;  %1061 = vst [vmem:[#allocation1] ss:$4 sm:$0xff] %v1636_v43 }
  0x4c   : >> { %1102 = vmatpush.bf16.msrb.mxu3 %v1725_v33 }
  0x4d   : >> { %929 = vmatpush.bf16.msrb.mxu0 %v1712_v34  ;;  %v1007_v49 = vrot.slane %v1005_v47, 1 }
  0x4e   : >> { %1043 = vmatpush.bf16.msrb.mxu2 %v1720_v36 }
  0x4f   : >> { %983 = vmatpush.bf16.msrb.mxu1 %v1716_v39  ;;  %v1008_v50 = vor.u32 %v1007_v49, %v1003_v46 }
  0x50   : >> { %1103 = vmatpush.bf16.msrb.mxu3 %v1724_v40  ;;  %1582 = vmatmul.msk.bf16.vlgmr.msrb.gmra.mxu0 %vm249_vm0, %v1557_v45 }
  0x51   : >> { %1635 = vmatmul.msk.bf16.vlgmr.msrb.gmra.mxu2 %vm249_vm0, %v1008_v50 }
  0x52   : >> { %1609 = vmatmul.msk.bf16.vlgmr.msrb.gmra.mxu1 %vm249_vm0, %v1584_v48  ;;  %v1062_v51 = vld.sshfl [vmem:[#allocation1] sm:$0xff pattern:$0x73625140] }
  0x53   : >> { %v1063_v52 = vshrl.u32 %v1062_v51, 16  ;;  %v1065_v53 = vshll.u32 %v1062_v51, 16 }
  0x55   : >> { %v1067_v54 = vrot.slane %v1065_v53, 1 }
  0x57   : >> { %v1068_v55 = vor.u32 %v1067_v54, %v1063_v52 }
  0x59   : >> { %1661 = vmatmul.msk.bf16.vlgmr.msrb.gmra.mxu3 %vm249_vm0, %v1068_v55 }
  0x9d   : >> { %v262_v56 = vpop.f32.mrf.mxu0 }
  0x9f   : >> { %v302_v57 = vpop.f32.mrf.mxu1 }
  0xa0   : >> { %v303_v1 = vadd.f32 %v302_v57, %v262_v56 }
  0xa4   : >> { %v361_v59 = vpop.f32.mrf.mxu2 }
  0xa5   : >> { %v264_v58 = vpop.f32.mrf.mxu0  ;;  %v365_v6 = vadd.f32 %v361_v59, %v303_v1 }
  0xa7   : >> { %v304_v60 = vpop.f32.mrf.mxu1 }
  0xac   : >> { %v363_v62 = vpop.f32.mrf.mxu2  ;;  %v421_v63 = vpop.f32.mrf.mxu3 }
  0xad   : >> { %v475_v61 = vpop.f32.mrf.mxu0  ;;  %v425_v7 = vadd.f32 %v421_v63, %v365_v6 }
  0xaf   : >> { %v529_v0 = vpop.f32.mrf.mxu1  ;;  %v479_v11 = vadd.f32 %v475_v61, %v425_v7 }
  0xb1   : >> { %v533_v13 = vadd.f32 %v529_v0, %v479_v11 }
  0xb4   : >> { %v423_v3 = vpop.f32.mrf.mxu3  ;;  %v589_v4 = vpop.f32.mrf.mxu2 }
  0xb5   : >> { %v477_v2 = vpop.f32.mrf.mxu0  ;;  %v593_v14 = vadd.f32 %v589_v4, %v533_v13 }
  0xb7   : >> { %v531_v5 = vpop.f32.mrf.mxu1 }
  0xbc   : >> { %v591_v9 = vpop.f32.mrf.mxu2  ;;  %v649_v10 = vpop.f32.mrf.mxu3 }
  0xbd   : >> { %v703_v8 = vpop.f32.mrf.mxu0  ;;  %v653_v18 = vadd.f32 %v649_v10, %v593_v14 }
  0xbf   : >> { %v757_v12 = vpop.f32.mrf.mxu1  ;;  %v707_v20 = vadd.f32 %v703_v8, %v653_v18 }
  0xc1   : >> { %v761_v24 = vadd.f32 %v757_v12, %v707_v20 }
  0xc4   : >> { %v651_v16 = vpop.f32.mrf.mxu3  ;;  %v817_v17 = vpop.f32.mrf.mxu2 }
  0xc5   : >> { %v705_v15 = vpop.f32.mrf.mxu0  ;;  %v821_v26 = vadd.f32 %v817_v17, %v761_v24 }
  0xc7   : >> { %v759_v19 = vpop.f32.mrf.mxu1 }
  0xcc   : >> { %v819_v22 = vpop.f32.mrf.mxu2  ;;  %v877_v23 = vpop.f32.mrf.mxu3 }
  0xcd   : >> { %v931_v21 = vpop.f32.mrf.mxu0  ;;  %v881_v27 = vadd.f32 %v877_v23, %v821_v26 }
  0xcf   : >> { %v985_v25 = vpop.f32.mrf.mxu1  ;;  %v935_v31 = vadd.f32 %v931_v21, %v881_v27 }
  0xd1   : >> { %v989_v33 = vadd.f32 %v985_v25, %v935_v31 }
  0xd4   : >> { %v879_v29 = vpop.f32.mrf.mxu3  ;;  %v1045_v30 = vpop.f32.mrf.mxu2 }
  0xd5   : >> { %v933_v28 = vpop.f32.mrf.mxu0  ;;  %v1049_v34 = vadd.f32 %v1045_v30, %v989_v33 }
  0xd7   : >> { %v987_v32 = vpop.f32.mrf.mxu1 }
  0xdc   : >> { %v1047_v36 = vpop.f32.mrf.mxu2  ;;  %v1105_v37 = vpop.f32.mrf.mxu3 }
  0xdd   : >> { %v1109_v38 = vadd.f32 %v1105_v37, %v1049_v34 }
  0xdf   : >> { %v1114_v39 = vadd.f32 %v1761_v35, %v1109_v38 }
  0xe1   : >> { %vm1115_vm1 = vcmp.ge.f32.partialorder %v1114_v39, 0.0  ;;  %v1116_v40 = vmul.f32 0.2, %v1114_v39 }
  0xe2   : > { %197 = sbr.rel (!%p195_p5) target bundleno = 16 (0x10), region = 93 }
  0xe3   : >> { %v1117_v41 = vsel %vm1115_vm1, %v1114_v39, %v1116_v40 }
  0xe4   : >> { %v1118_v42 = vpack.c.bf16 %v1117_v41, %v1117_v41  ;;  %v1107_v43 = vpop.f32.mrf.mxu3 }
  0xe6   : >> { %1120 = vst [vmem:[%s1119_s8] sm:$0x1] %v1118_v42 }
  0xe7 PF: > { %s13_s14 = sadd.s32 1, %s1788_s14   ;;  %s2096_s12 = smov %s1784_s13 }
  0xe8   : > { %p10_p6 = scmp.ge.s32.totalorder %s13_s14, 4   ;;  %s2097_s13 = smov %s2099_s15 }
  0xea   :  { %12 = sbr.rel (!%p10_p6) target bundleno = 2 (0x2), region = 104 }

</bundles_post_ra>
